<compile_context>
chip_gen: v7x
topology: tpu7x:2x2x1
jax: 0.10.0
libtpu: 0.0.40
codegen_flags: <defaults>
</compile_context>

<pallas_src>
import functools
import math

import jax
import jax.numpy as jnp
from jax.experimental import pallas as pl
from jax.experimental.pallas import tpu as pltpu


def _round_up(x, m):
    return ((x + m - 1) // m) * m


def _batch_pad_multiple(weight_dtype):
    # bf16 activations pack two rows per sublane -> pad batch to 16 so the
    # in-kernel casts produce full packed tiles (8 is enough for f32).
    return 8 if jnp.dtype(weight_dtype).itemsize == 4 else 16


def _vmem_limit_bytes(T, b_pad, k0_pad, h_pad, w_itemsize):
    """Explicit scoped-VMEM budget for the double-buffered weight pipeline."""
    f32 = 4
    three_h = 3 * h_pad
    need = (
        2 * b_pad * k0_pad * f32            # timestep-input blocks (double buffered)
        + 2 * b_pad * h_pad * f32           # initial-hidden blocks
        + 2 * k0_pad * three_h * w_itemsize  # layer-0 W_ih (resident)
        + 2 * h_pad * three_h * w_itemsize   # layers>=1 W_ih
        + 2 * h_pad * three_h * w_itemsize   # W_hh
        + 2 * 8 * three_h * f32             # fused biases (sublane padded)
        + 2 * 8 * h_pad * f32               # b_hn
        + 2 * 2 * b_pad * h_pad * f32       # two outputs, double buffered
        + T * b_pad * h_pad * f32           # inter-layer activation scratch
        + b_pad * h_pad * f32               # recurrent hidden carry
        + b_pad * three_h * f32             # fused input-gate scratch
    )
    # Headroom for compiler-internal scratch; clamp to a range valid on
    # v5e/v6e (128 MiB physical) and small enough at these sizes for v7x (64 MiB).
    return int(min(max(need + (8 << 20), 32 << 20), 96 << 20))


# -----------------------------------------------------------------------------
# Kernel: grid=(num_layers, T), layer-outer / time-inner.
# -----------------------------------------------------------------------------
def _stacked_gru_kernel(xs_ref, h0_ref, wih0_ref, wihr_ref, whh_ref, bi_ref,
                        bhn_ref, out_ref, hlast_ref, act_ref, hcarry_ref,
                        gi_ref, *, h_pad):
    """PyTorch GRUCell semantics (gate order r, z, n), fused 3H-wide projections.

    r  = sigmoid(x W_ir + h W_hr + (b_ir + b_hr))
    z  = sigmoid(x W_iz + h W_hz + (b_iz + b_hz))
    n  = tanh  (x W_in + b_in + r * (h W_hn + b_hn))
    h' = n + z * (h - n)          # == (1 - z) * n + z * h
    """
    layer = pl.program_id(0)
    t = pl.program_id(1)
    w_dtype = whh_ref.dtype  # f32 or bf16 weights

    # Start of a layer: load that layer's previous hidden state into the carry.
    @pl.when(t == 0)
    def _():
        hcarry_ref[...] = h0_ref[0]

    # Input-side fused projection.  Layer 0 consumes the (resident) K0-wide
    # W_ih_0; layers >= 1 consume only H-wide W_ih and read the previous
    # layer's activation (VMEM resident, written in place below).
    @pl.when(layer == 0)
    def _():
        gi_ref[...] = jnp.dot(xs_ref[0].astype(w_dtype), wih0_ref[...],
                              preferred_element_type=jnp.float32)

    @pl.when(layer > 0)
    def _():
        gi_ref[...] = jnp.dot(act_ref[t].astype(w_dtype), wihr_ref[0],
                              preferred_element_type=jnp.float32)

    h = hcarry_ref[...]                                     # (B_pad, H_pad) f32
    gi = gi_ref[...] + bi_ref[0]                            # (B_pad, 3H_pad)
    gh = jnp.dot(h.astype(w_dtype), whh_ref[0],
                 preferred_element_type=jnp.float32)        # (B_pad, 3H_pad)

    r = jax.nn.sigmoid(gi[:, 0 * h_pad:1 * h_pad] + gh[:, 0 * h_pad:1 * h_pad])
    z = jax.nn.sigmoid(gi[:, 1 * h_pad:2 * h_pad] + gh[:, 1 * h_pad:2 * h_pad])
    n = jnp.tanh(gi[:, 2 * h_pad:3 * h_pad]
                 + r * (gh[:, 2 * h_pad:3 * h_pad] + bhn_ref[0]))

    h_new = n + z * (h - n)

    hcarry_ref[...] = h_new          # recurrent carry (VMEM)
    act_ref[t] = h_new               # input of layer+1 at time t (dropout = id)
    out_ref[0] = h_new               # HBM keeps only the last layer's write
    hlast_ref[0] = h_new             # HBM keeps only the last timestep's write
    # TODO(synk): training-mode dropout of act_ref[t] between layers.


# -----------------------------------------------------------------------------
# Padded-layout core (use directly inside decode loops to avoid per-token
# host-side pad/slice ops).
# -----------------------------------------------------------------------------
def stacked_gru_sequence_padded(xs_p, h_p, packed):
    """xs_p: (T, B_pad, K0_pad) f32, h_p: (L, B_pad, H_pad) f32 (zero padded).

    Returns (outputs_p (T, B_pad, H_pad), new_hidden_p (L, B_pad, H_pad))."""
    wih0 = packed["wih0"]
    wihr = packed["wih_rest"]
    whh = packed["whh"]
    bi = packed["bi"]
    bhn = packed["bhn"]

    T, b_pad, k0_pad = xs_p.shape
    L, _, h_pad = h_p.shape
    three_h = 3 * h_pad

    kernel = functools.partial(_stacked_gru_kernel, h_pad=h_pad)

    grid_spec = pltpu.PrefetchScalarGridSpec(
        num_scalar_prefetch=0,
        grid=(L, T),  # layer outer, time inner: weights DMA'd once per T steps
        in_specs=[
            # timestep inputs: streamed over t at layer 0; pinned to block 0 for
            # layers >= 1 (never read there) so they are not re-streamed.
            pl.BlockSpec((1, b_pad, k0_pad),
                         lambda l, t: (jnp.where(l == 0, t, 0), 0, 0)),
            # layer l's initial hidden state (one DMA per layer)
            pl.BlockSpec((1, b_pad, h_pad), lambda l, t: (l, 0, 0)),
            # layer-0 input weights: resident (constant block index)
            pl.BlockSpec((k0_pad, three_h), lambda l, t: (0, 0)),
            # layers >= 1 input weights: one DMA per layer (layer 1 prefetched
            # during layer 0 since the clamped index is already 0 there)
            pl.BlockSpec((1, h_pad, three_h),
                         lambda l, t: (jnp.maximum(l, 1) - 1, 0, 0)),
            # hidden weights: one DMA per layer
            pl.BlockSpec((1, h_pad, three_h), lambda l, t: (l, 0, 0)),
            # fused biases (r/z pre-summed, n slot = b_in) and separate b_hn
            pl.BlockSpec((1, 1, three_h), lambda l, t: (l, 0, 0)),
            pl.BlockSpec((1, 1, h_pad), lambda l, t: (l, 0, 0)),
        ],
        out_specs=[
            # per-timestep output (final layer's value is the last write per t)
            pl.BlockSpec((1, b_pad, h_pad), lambda l, t: (t, 0, 0)),
            # per-layer final hidden state (last timestep's write per layer)
            pl.BlockSpec((1, b_pad, h_pad), lambda l, t: (l, 0, 0)),
        ],
        scratch_shapes=[
            pltpu.VMEM((T, b_pad, h_pad), jnp.float32),   # inter-layer activations
            pltpu.VMEM((b_pad, h_pad), jnp.float32),      # recurrent hidden carry
            pltpu.VMEM((b_pad, three_h), jnp.float32),    # fused input-gate scratch
        ],
    )

    outs_p, hlast_p = pl.pallas_call(
        kernel,
        out_shape=(jax.ShapeDtypeStruct((T, b_pad, h_pad), jnp.float32),
                   jax.ShapeDtypeStruct((L, b_pad, h_pad), jnp.float32)),
        grid_spec=grid_spec,
        compiler_params=pltpu.CompilerParams(
            # Both axes carry sequential dependencies -> "arbitrary".
            dimension_semantics=("arbitrary", "arbitrary"),
            vmem_limit_bytes=_vmem_limit_bytes(T, b_pad, k0_pad, h_pad,
                                               whh.dtype.itemsize),
        ),
        # In-place writeback of the hidden state (h_p input -> new-hidden output).
        input_output_aliases={1: 1},
    )(xs_p, h_p, wih0, wihr, whh, bi, bhn)
    return outs_p, hlast_p


# -----------------------------------------------------------------------------
# Convenience wrappers (pad once, slice once).
# -----------------------------------------------------------------------------
def stacked_gru_sequence(xs, hidden, packed):
    """Teacher-forced multi-timestep StackedGRU.

    xs: (T, batch, input_size); hidden: (num_layers, batch, rnn_size)
    returns (outputs (T, batch, rnn_size), new_hidden (num_layers, batch, rnn_size))
    """
    T, B, in_sz = xs.shape
    L = hidden.shape[0]
    H = packed["rnn_size"]
    h_pad, k0_pad = packed["h_pad"], packed["k0_pad"]
    b_pad = _round_up(B, _batch_pad_multiple(packed["whh"].dtype))

    xs_p = jnp.zeros((T, b_pad, k0_pad), jnp.float32).at[:, :B, :in_sz].set(xs)
    h_p = jnp.zeros((L, b_pad, h_pad), jnp.float32).at[:, :B, :H].set(hidden)

    outs_p, hnew_p = stacked_gru_sequence_padded(xs_p, h_p, packed)
    return outs_p[:, :B, :H], hnew_p[:, :B, :H]


def stacked_gru_forward(x, hidden, packed):
    """One StackedGRU timestep (exact PyTorch StackedGRU.forward semantics, eval).

    x: (batch, input_size); hidden: (num_layers, batch, rnn_size)
    returns (output (batch, rnn_size), new_hidden (num_layers, batch, rnn_size))
    """
    outs, new_hidden = stacked_gru_sequence(x[None], hidden, packed)
    return outs[0], new_hidden


# -----------------------------------------------------------------------------
# Parameter init (PyTorch nn.GRUCell shapes) and packing into the fused layout.
# -----------------------------------------------------------------------------
def init_stacked_gru_params(key, input_size, rnn_size, num_layers):
    """PyTorch-shaped params: weight_ih (3H, in), weight_hh (3H, H), biases (3H,).
    Gate order (r, z, n), uniform(-1/sqrt(H), 1/sqrt(H)) init like nn.GRUCell."""
    params = []
    bound = 1.0 / math.sqrt(rnn_size)
    in_sz = input_size
    for _ in range(num_layers):
        key, k1, k2, k3, k4 = jax.random.split(key, 5)
        wih = jax.random.uniform(k1, (3 * rnn_size, in_sz), jnp.float32, -bound, bound)
        whh = jax.random.uniform(k2, (3 * rnn_size, rnn_size), jnp.float32, -bound, bound)
        bih = jax.random.uniform(k3, (3 * rnn_size,), jnp.float32, -bound, bound)
        bhh = jax.random.uniform(k4, (3 * rnn_size,), jnp.float32, -bound, bound)
        params.append((wih, whh, bih, bhh))
        in_sz = rnn_size
    return params


def pack_stacked_gru_params(layer_params, input_size, rnn_size, *,
                            weight_dtype=jnp.bfloat16):
    """Pack per-layer GRUCell params into transposed, gate-fused, padded arrays.

    wih0    : (K0_pad, 3*H_pad)        layer-0 input weights (gate g at cols
                                       [g*H_pad, g*H_pad+H))
    wih_rest: (max(L-1,1), H_pad, 3*H_pad)  layers >= 1 input weights
    whh     : (L, H_pad, 3*H_pad)
    bi      : (L, 1, 3*H_pad) f32      r/z slots hold b_i*+b_h*, n slot holds b_in
    bhn     : (L, 1, H_pad)   f32      b_hn (multiplied by r inside the tanh gate)
    """
    H = rnn_size
    L = len(layer_params)
    h_pad = _round_up(H, 128)
    k0_pad = _round_up(input_size, 128)
    three_h = 3 * h_pad

    def fuse_w(w, rows, row_pad):
        out = jnp.zeros((row_pad, three_h), jnp.float32)
        for g in range(3):
            out = out.at[:rows, g * h_pad:g * h_pad + H].set(w[g * H:(g + 1) * H, :].T)
        return out.astype(weight_dtype)

    wih0 = None
    wihr_list, whh_list, bi_list, bhn_list = [], [], [], []
    for lidx, (wih, whh, bih, bhh) in enumerate(layer_params):
        if lidx == 0:
            wih0 = fuse_w(wih, input_size, k0_pad)
        else:
            wihr_list.append(fuse_w(wih, H, h_pad))
        whh_list.append(fuse_w(whh, H, h_pad))

        bi = jnp.zeros((1, three_h), jnp.float32)
        bi = bi.at[0, 0 * h_pad:0 * h_pad + H].set(bih[0:H] + bhh[0:H])
        bi = bi.at[0, 1 * h_pad:1 * h_pad + H].set(bih[H:2 * H] + bhh[H:2 * H])
        bi = bi.at[0, 2 * h_pad:2 * h_pad + H].set(bih[2 * H:3 * H])
        bhn = jnp.zeros((1, h_pad), jnp.float32).at[0, :H].set(bhh[2 * H:3 * H])
        bi_list.append(bi)
        bhn_list.append(bhn)

    if not wihr_list:  # num_layers == 1: dummy block (never read by the kernel)
        wihr_list.append(jnp.zeros((h_pad, three_h), weight_dtype))

    return dict(
        wih0=wih0,
        wih_rest=jnp.stack(wihr_list),
        whh=jnp.stack(whh_list),
        bi=jnp.stack(bi_list),
        bhn=jnp.stack(bhn_list),
        input_size=input_size,
        rnn_size=rnn_size,
        h_pad=h_pad,
        k0_pad=k0_pad,
    )


# -----------------------------------------------------------------------------
# Pure-JAX reference (PyTorch GRUCell semantics) for correctness checking.
# -----------------------------------------------------------------------------
def _gru_cell_ref(x, h, wih, whh, bih, bhh, compute_dtype):
    H = h.shape[-1]
    gi = jnp.dot(x.astype(compute_dtype), wih.T.astype(compute_dtype),
                 preferred_element_type=jnp.float32) + bih
    gh = jnp.dot(h.astype(compute_dtype), whh.T.astype(compute_dtype),
                 preferred_element_type=jnp.float32) + bhh
    r = jax.nn.sigmoid(gi[:, :H] + gh[:, :H])
    z = jax.nn.sigmoid(gi[:, H:2 * H] + gh[:, H:2 * H])
    n = jnp.tanh(gi[:, 2 * H:] + r * gh[:, 2 * H:])
    return (1.0 - z) * n + z * h


def _stacked_ref_step(x, hidden, layer_params, compute_dtype):
    hs = []
    inp = x
    for i, (wih, whh, bih, bhh) in enumerate(layer_params):
        h_new = _gru_cell_ref(inp, hidden[i], wih, whh, bih, bhh, compute_dtype)
        inp = h_new  # dropout is identity in eval mode
        hs.append(h_new)
    return inp, jnp.stack(hs)


def _stacked_ref_sequence(xs, hidden, layer_params, compute_dtype):
    outs = []
    h = hidden
    for t in range(xs.shape[0]):
        out, h = _stacked_ref_step(xs[t], h, layer_params, compute_dtype)
        outs.append(out)
    return jnp.stack(outs), h


if __name__ == "__main__":
    batch = 4
    input_size = 16
    rnn_size = 32
    num_layers = 2
    T = 6

    key = jax.random.PRNGKey(0)
    key, kx, ks, kh, kp = jax.random.split(key, 5)
    x = jax.random.normal(kx, (batch, input_size), jnp.float32)
    xs = jax.random.normal(ks, (T, batch, input_size), jnp.float32)
    hidden = jax.random.normal(kh, (num_layers, batch, rnn_size), jnp.float32)
    params = init_stacked_gru_params(kp, input_size, rnn_size, num_layers)

    # --- single timestep (the PyTorch module's forward), f32 and bf16 weights ---
    for weight_dtype, atol in ((jnp.float32, 1e-4), (jnp.bfloat16, 2e-2)):
        packed = pack_stacked_gru_params(params, input_size, rnn_size,
                                         weight_dtype=weight_dtype)
        out, new_hidden = stacked_gru_forward(x, hidden, packed)
        out = jax.block_until_ready(out)
        new_hidden = jax.block_until_ready(new_hidden)

        out_ref, hidden_ref = _stacked_ref_step(x, hidden, params, weight_dtype)
        assert out.shape == (batch, rnn_size)
        assert new_hidden.shape == (num_layers, batch, rnn_size)
        assert jnp.allclose(out, out_ref, atol=atol, rtol=atol), (
            weight_dtype, float(jnp.max(jnp.abs(out - out_ref))))
        assert jnp.allclose(new_hidden, hidden_ref, atol=atol, rtol=atol), (
            weight_dtype, float(jnp.max(jnp.abs(new_hidden - hidden_ref))))

    # --- multi-timestep (weight DMA amortized over T), f32 weights ---
    packed = pack_stacked_gru_params(params, input_size, rnn_size,
                                     weight_dtype=jnp.float32)
    outs, h_final = stacked_gru_sequence(xs, hidden, packed)
    outs = jax.block_until_ready(outs)
    h_final = jax.block_until_ready(h_final)

    outs_ref, h_final_ref = _stacked_ref_sequence(xs, hidden, params, jnp.float32)
    assert outs.shape == (T, batch, rnn_size)
    assert h_final.shape == (num_layers, batch, rnn_size)
    assert jnp.allclose(outs, outs_ref, atol=1e-3, rtol=1e-3), (
        float(jnp.max(jnp.abs(outs - outs_ref))))
    assert jnp.allclose(h_final, h_final_ref, atol=1e-3, rtol=1e-3), (
        float(jnp.max(jnp.abs(h_final - h_final_ref))))

    print("KERNEL_OK")
</pallas_src>

<mosaic_0001>
module attributes {stable_mosaic.version = 11 : i64} {
  func.func @_stacked_gru_kernel(%arg0: i32, %arg1: i32, %arg2: memref<1x8x128xf32, #tpu.memory_space<vmem>>, %arg3: memref<1x8x128xf32, #tpu.memory_space<vmem>>, %arg4: memref<128x384xf32, #tpu.memory_space<vmem>>, %arg5: memref<1x128x384xf32, #tpu.memory_space<vmem>>, %arg6: memref<1x128x384xf32, #tpu.memory_space<vmem>>, %arg7: memref<1x1x384xf32, #tpu.memory_space<vmem>>, %arg8: memref<1x1x128xf32, #tpu.memory_space<vmem>>, %arg9: memref<1x8x128xf32, #tpu.memory_space<vmem>>, %arg10: memref<1x8x128xf32, #tpu.memory_space<vmem>>, %arg11: memref<1x8x128xf32, #tpu.memory_space<vmem>>, %arg12: memref<8x128xf32, #tpu.memory_space<vmem>>, %arg13: memref<8x384xf32, #tpu.memory_space<vmem>>) attributes {dimension_semantics = [#tpu.dimension_semantics<arbitrary>, #tpu.dimension_semantics<arbitrary>], iteration_bounds = array<i64: 2, 1>, scalar_prefetch = 0 : i64, scratch_operands = 3 : i64, tpu.core_type = #tpu.core_type<tc>, window_params = [{transform_indices = @transform_0, window_bounds = array<i64: 1, 8, 128>}, {transform_indices = @transform_1, window_bounds = array<i64: 1, 8, 128>}, {pipeline_mode = #tpu.pipeline_mode<synchronous>, transform_indices = @transform_2, window_bounds = array<i64: 128, 384>}, {transform_indices = @transform_3, window_bounds = array<i64: 1, 128, 384>}, {transform_indices = @transform_4, window_bounds = array<i64: 1, 128, 384>}, {transform_indices = @transform_5, window_bounds = array<i64: 1, 1, 384>}, {transform_indices = @transform_6, window_bounds = array<i64: 1, 1, 128>}, {transform_indices = @transform_7, window_bounds = array<i64: 1, 8, 128>}, {transform_indices = @transform_8, window_bounds = array<i64: 1, 8, 128>}]} {
    %c0_i32 = arith.constant 0 : i32
    %0 = arith.cmpi eq, %arg1, %c0_i32 : i32
    %1 = arith.extui %0 : i1 to i32
    %c0_i32_0 = arith.constant 0 : i32
    %2 = arith.cmpi ne, %1, %c0_i32_0 : i32
    scf.if %2 {
      %c0_29 = arith.constant 0 : index
      %c0_30 = arith.constant 0 : index
      %c0_31 = arith.constant 0 : index
      %57 = vector.load %arg3[%c0_29, %c0_30, %c0_31] : memref<1x8x128xf32, #tpu.memory_space<vmem>>, vector<1x8x128xf32>
      %58 = vector.shape_cast %57 : vector<1x8x128xf32> to vector<8x128xf32>
      %c0_32 = arith.constant 0 : index
      %c0_33 = arith.constant 0 : index
      %59 = vector.load %arg12[%c0_32, %c0_33] : memref<8x128xf32, #tpu.memory_space<vmem>>, vector<8x128xf32>
      tpu.vector_store %arg12[%c0_32, %c0_33], %58 {strides = array<i32>} : memref<8x128xf32, #tpu.memory_space<vmem>>, vector<8x128xf32>,
    } else {
    }
    %c0_i32_1 = arith.constant 0 : i32
    %3 = arith.cmpi eq, %arg0, %c0_i32_1 : i32
    %4 = arith.extui %3 : i1 to i32
    %c0_i32_2 = arith.constant 0 : i32
    %5 = arith.cmpi ne, %4, %c0_i32_2 : i32
    scf.if %5 {
      %c0_29 = arith.constant 0 : index
      %c0_30 = arith.constant 0 : index
      %c0_31 = arith.constant 0 : index
      %57 = vector.load %arg2[%c0_29, %c0_30, %c0_31] : memref<1x8x128xf32, #tpu.memory_space<vmem>>, vector<1x8x128xf32>
      %58 = vector.shape_cast %57 : vector<1x8x128xf32> to vector<8x128xf32>
      %c0_32 = arith.constant 0 : index
      %c0_33 = arith.constant 0 : index
      %59 = vector.load %arg4[%c0_32, %c0_33] : memref<128x384xf32, #tpu.memory_space<vmem>>, vector<128x384xf32>
      %cst_34 = arith.constant dense<0.000000e+00> : vector<8x384xf32>
      %60 = tpu.matmul %58, %59, %cst_34 {dimension_numbers = #tpu.dot_dimension_numbers<[1], [0], [0], [1], [0, 0, 1, 1], [], []>} : vector<8x128xf32>, vector<128x384xf32>, vector<8x384xf32> -> vector<8x384xf32>
      %c0_35 = arith.constant 0 : index
      %c0_36 = arith.constant 0 : index
      %61 = vector.load %arg13[%c0_35, %c0_36] : memref<8x384xf32, #tpu.memory_space<vmem>>, vector<8x384xf32>
      tpu.vector_store %arg13[%c0_35, %c0_36], %60 {strides = array<i32>} : memref<8x384xf32, #tpu.memory_space<vmem>>, vector<8x384xf32>,
    } else {
    }
    %c0_i32_3 = arith.constant 0 : i32
    %6 = arith.cmpi sgt, %arg0, %c0_i32_3 : i32
    %7 = arith.extui %6 : i1 to i32
    %c0_i32_4 = arith.constant 0 : i32
    %8 = arith.cmpi ne, %7, %c0_i32_4 : i32
    scf.if %8 {
      %57 = arith.index_cast %arg1 : i32 to index
      %c0_29 = arith.constant 0 : index
      %c0_30 = arith.constant 0 : index
      %58 = vector.load %arg11[%57, %c0_29, %c0_30] : memref<1x8x128xf32, #tpu.memory_space<vmem>>, vector<1x8x128xf32>
      %59 = vector.shape_cast %58 : vector<1x8x128xf32> to vector<8x128xf32>
      %c0_31 = arith.constant 0 : index
      %c0_32 = arith.constant 0 : index
      %c0_33 = arith.constant 0 : index
      %60 = vector.load %arg5[%c0_31, %c0_32, %c0_33] : memref<1x128x384xf32, #tpu.memory_space<vmem>>, vector<1x128x384xf32>
      %61 = vector.shape_cast %60 : vector<1x128x384xf32> to vector<128x384xf32>
      %cst_34 = arith.constant dense<0.000000e+00> : vector<8x384xf32>
      %62 = tpu.matmul %59, %61, %cst_34 {dimension_numbers = #tpu.dot_dimension_numbers<[1], [0], [0], [1], [0, 0, 1, 1], [], []>} : vector<8x128xf32>, vector<128x384xf32>, vector<8x384xf32> -> vector<8x384xf32>
      %c0_35 = arith.constant 0 : index
      %c0_36 = arith.constant 0 : index
      %63 = vector.load %arg13[%c0_35, %c0_36] : memref<8x384xf32, #tpu.memory_space<vmem>>, vector<8x384xf32>
      tpu.vector_store %arg13[%c0_35, %c0_36], %62 {strides = array<i32>} : memref<8x384xf32, #tpu.memory_space<vmem>>, vector<8x384xf32>,
    } else {
    }
    %c0 = arith.constant 0 : index
    %c0_5 = arith.constant 0 : index
    %9 = vector.load %arg12[%c0, %c0_5] : memref<8x128xf32, #tpu.memory_space<vmem>>, vector<8x128xf32>
    %c0_6 = arith.constant 0 : index
    %c0_7 = arith.constant 0 : index
    %10 = vector.load %arg13[%c0_6, %c0_7] : memref<8x384xf32, #tpu.memory_space<vmem>>, vector<8x384xf32>
    %c0_8 = arith.constant 0 : index
    %c0_9 = arith.constant 0 : index
    %c0_10 = arith.constant 0 : index
    %11 = vector.load %arg7[%c0_8, %c0_9, %c0_10] : memref<1x1x384xf32, #tpu.memory_space<vmem>>, vector<1x1x384xf32>
    %12 = vector.shape_cast %11 : vector<1x1x384xf32> to vector<1x384xf32>
    %13 = vector.broadcast %12 : vector<1x384xf32> to vector<8x384xf32>
    %14 = arith.addf %10, %13 : vector<8x384xf32>
    %c0_11 = arith.constant 0 : index
    %c0_12 = arith.constant 0 : index
    %c0_13 = arith.constant 0 : index
    %15 = vector.load %arg6[%c0_11, %c0_12, %c0_13] : memref<1x128x384xf32, #tpu.memory_space<vmem>>, vector<1x128x384xf32>
    %16 = vector.shape_cast %15 : vector<1x128x384xf32> to vector<128x384xf32>
    %cst = arith.constant dense<0.000000e+00> : vector<8x384xf32>
    %17 = tpu.matmul %9, %16, %cst {dimension_numbers = #tpu.dot_dimension_numbers<[1], [0], [0], [1], [0, 0, 1, 1], [], []>} : vector<8x128xf32>, vector<128x384xf32>, vector<8x384xf32> -> vector<8x384xf32>
    %18 = vector.extract_strided_slice %14 {offsets = [0, 0], sizes = [8, 128], strides = [1, 1]} : vector<8x384xf32> to vector<8x128xf32>
    %19 = vector.extract_strided_slice %17 {offsets = [0, 0], sizes = [8, 128], strides = [1, 1]} : vector<8x384xf32> to vector<8x128xf32>
    %20 = arith.addf %18, %19 : vector<8x128xf32>
    %21 = arith.negf %20 : vector<8x128xf32>
    %22 = math.exp %21 : vector<8x128xf32>
    %cst_14 = arith.constant 1.000000e+00 : f32
    %23 = vector.broadcast %cst_14 : f32 to vector<8x128xf32>
    %24 = arith.addf %23, %22 : vector<8x128xf32>
    %25 = arith.divf %23, %24 : vector<8x128xf32>
    %26 = vector.extract_strided_slice %14 {offsets = [0, 128], sizes = [8, 128], strides = [1, 1]} : vector<8x384xf32> to vector<8x128xf32>
    %27 = vector.extract_strided_slice %17 {offsets = [0, 128], sizes = [8, 128], strides = [1, 1]} : vector<8x384xf32> to vector<8x128xf32>
    %28 = arith.addf %26, %27 : vector<8x128xf32>
    %29 = arith.negf %28 : vector<8x128xf32>
    %30 = math.exp %29 : vector<8x128xf32>
    %cst_15 = arith.constant 1.000000e+00 : f32
    %31 = vector.broadcast %cst_15 : f32 to vector<8x128xf32>
    %32 = arith.addf %31, %30 : vector<8x128xf32>
    %33 = arith.divf %31, %32 : vector<8x128xf32>
    %34 = vector.extract_strided_slice %14 {offsets = [0, 256], sizes = [8, 128], strides = [1, 1]} : vector<8x384xf32> to vector<8x128xf32>
    %35 = vector.extract_strided_slice %17 {offsets = [0, 256], sizes = [8, 128], strides = [1, 1]} : vector<8x384xf32> to vector<8x128xf32>
    %c0_16 = arith.constant 0 : index
    %c0_17 = arith.constant 0 : index
    %c0_18 = arith.constant 0 : index
    %36 = vector.load %arg8[%c0_16, %c0_17, %c0_18] : memref<1x1x128xf32, #tpu.memory_space<vmem>>, vector<1x1x128xf32>
    %37 = vector.shape_cast %36 : vector<1x1x128xf32> to vector<1x128xf32>
    %38 = vector.broadcast %37 : vector<1x128xf32> to vector<8x128xf32>
    %39 = arith.addf %35, %38 : vector<8x128xf32>
    %40 = arith.mulf %25, %39 : vector<8x128xf32>
    %41 = arith.addf %34, %40 : vector<8x128xf32>
    %42 = math.tanh %41 : vector<8x128xf32>
    %43 = arith.subf %9, %42 : vector<8x128xf32>
    %44 = arith.mulf %33, %43 : vector<8x128xf32>
    %45 = arith.addf %42, %44 : vector<8x128xf32>
    %c0_19 = arith.constant 0 : index
    %c0_20 = arith.constant 0 : index
    %46 = vector.load %arg12[%c0_19, %c0_20] : memref<8x128xf32, #tpu.memory_space<vmem>>, vector<8x128xf32>
    tpu.vector_store %arg12[%c0_19, %c0_20], %45 {strides = array<i32>} : memref<8x128xf32, #tpu.memory_space<vmem>>, vector<8x128xf32>,
    %47 = arith.index_cast %arg1 : i32 to index
    %c0_21 = arith.constant 0 : index
    %c0_22 = arith.constant 0 : index
    %48 = vector.load %arg11[%47, %c0_21, %c0_22] : memref<1x8x128xf32, #tpu.memory_space<vmem>>, vector<1x8x128xf32>
    %49 = vector.shape_cast %48 : vector<1x8x128xf32> to vector<8x128xf32>
    %50 = vector.shape_cast %45 : vector<8x128xf32> to vector<1x8x128xf32>
    tpu.vector_store %arg11[%47, %c0_21, %c0_22], %50 {strides = array<i32>} : memref<1x8x128xf32, #tpu.memory_space<vmem>>, vector<1x8x128xf32>,
    %c0_23 = arith.constant 0 : index
    %c0_24 = arith.constant 0 : index
    %c0_25 = arith.constant 0 : index
    %51 = vector.load %arg9[%c0_23, %c0_24, %c0_25] : memref<1x8x128xf32, #tpu.memory_space<vmem>>, vector<1x8x128xf32>
    %52 = vector.shape_cast %51 : vector<1x8x128xf32> to vector<8x128xf32>
    %53 = vector.shape_cast %45 : vector<8x128xf32> to vector<1x8x128xf32>
    tpu.vector_store %arg9[%c0_23, %c0_24, %c0_25], %53 {strides = array<i32>} : memref<1x8x128xf32, #tpu.memory_space<vmem>>, vector<1x8x128xf32>,
    %c0_26 = arith.constant 0 : index
    %c0_27 = arith.constant 0 : index
    %c0_28 = arith.constant 0 : index
    %54 = vector.load %arg10[%c0_26, %c0_27, %c0_28] : memref<1x8x128xf32, #tpu.memory_space<vmem>>, vector<1x8x128xf32>
    %55 = vector.shape_cast %54 : vector<1x8x128xf32> to vector<8x128xf32>
    %56 = vector.shape_cast %45 : vector<8x128xf32> to vector<1x8x128xf32>
    tpu.vector_store %arg10[%c0_26, %c0_27, %c0_28], %56 {strides = array<i32>} : memref<1x8x128xf32, #tpu.memory_space<vmem>>, vector<1x8x128xf32>,
    return
  }
  func.func @transform_0(%arg0: i32, %arg1: i32) -> (i32, i32, i32) {
    %c0_i32 = arith.constant 0 : i32
    %0 = arith.cmpi eq, %arg0, %c0_i32 : i32
    %c0_i32_0 = arith.constant 0 : i32
    %1 = arith.select %0, %arg1, %c0_i32_0 : i32
    %c0_i32_1 = arith.constant 0 : i32
    %c0_i32_2 = arith.constant 0 : i32
    %c0_i32_3 = arith.constant 0 : i32
    return %1, %c0_i32_1, %c0_i32_2 : i32, i32, i32
  }
  func.func @transform_1(%arg0: i32, %arg1: i32) -> (i32, i32, i32) {
    %c0_i32 = arith.constant 0 : i32
    %c0_i32_0 = arith.constant 0 : i32
    %c0_i32_1 = arith.constant 0 : i32
    return %arg0, %c0_i32, %c0_i32_0 : i32, i32, i32
  }
  func.func @transform_2(%arg0: i32, %arg1: i32) -> (i32, i32) {
    %c0_i32 = arith.constant 0 : i32
    %c0_i32_0 = arith.constant 0 : i32
    %c0_i32_1 = arith.constant 0 : i32
    return %c0_i32, %c0_i32_0 : i32, i32
  }
  func.func @transform_3(%arg0: i32, %arg1: i32) -> (i32, i32, i32) {
    %c1_i32 = arith.constant 1 : i32
    %0 = arith.maxsi %arg0, %c1_i32 : i32
    %c1_i32_0 = arith.constant 1 : i32
    %1 = arith.subi %0, %c1_i32_0 : i32
    %c0_i32 = arith.constant 0 : i32
    %c0_i32_1 = arith.constant 0 : i32
    %c0_i32_2 = arith.constant 0 : i32
    return %1, %c0_i32, %c0_i32_1 : i32, i32, i32
  }
  func.func @transform_4(%arg0: i32, %arg1: i32) -> (i32, i32, i32) {
    %c0_i32 = arith.constant 0 : i32
    %c0_i32_0 = arith.constant 0 : i32
    %c0_i32_1 = arith.constant 0 : i32
    return %arg0, %c0_i32, %c0_i32_0 : i32, i32, i32
  }
  func.func @transform_5(%arg0: i32, %arg1: i32) -> (i32, i32, i32) {
    %c0_i32 = arith.constant 0 : i32
    %c0_i32_0 = arith.constant 0 : i32
    %c0_i32_1 = arith.constant 0 : i32
    return %arg0, %c0_i32, %c0_i32_0 : i32, i32, i32
  }
  func.func @transform_6(%arg0: i32, %arg1: i32) -> (i32, i32, i32) {
    %c0_i32 = arith.constant 0 : i32
    %c0_i32_0 = arith.constant 0 : i32
    %c0_i32_1 = arith.constant 0 : i32
    return %arg0, %c0_i32, %c0_i32_0 : i32, i32, i32
  }
  func.func @transform_7(%arg0: i32, %arg1: i32) -> (i32, i32, i32) {
    %c0_i32 = arith.constant 0 : i32
    %c0_i32_0 = arith.constant 0 : i32
    %c0_i32_1 = arith.constant 0 : i32
    return %arg1, %c0_i32, %c0_i32_0 : i32, i32, i32
  }
  func.func @transform_8(%arg0: i32, %arg1: i32) -> (i32, i32, i32) {
    %c0_i32 = arith.constant 0 : i32
    %c0_i32_0 = arith.constant 0 : i32
    %c0_i32_1 = arith.constant 0 : i32
    return %arg0, %c0_i32, %c0_i32_0 : i32, i32, i32
  }
}

</mosaic_0001>

<bundles_post_ra>
// kernel: tpu_custom_call.1
= control target key start
LH: loop header
LB: loop body
LE: loop exit
PB: predicated region body
PF: predicated region fallthrough
CT: control target
= control target key end

     0   :  { %s2696_s0 = inlined_call_operand.vmem [shape: f32[1,8,128], index: 0, kind: input, shape index: {}]   ;;  %s2697_s1 = inlined_call_operand.hbm [shape: f32[2,8,128], index: 1, kind: input, shape index: {}, may-alias: {1,8}]   ;;  %s2698_s2 = inlined_call_operand.hbm [shape: f32[128,384], index: 2, kind: input, shape index: {}]   ;;  %s2699_s3 = inlined_call_operand.hbm [shape: f32[1,128,384], index: 3, kind: input, shape index: {}]   ;;  %s2700_s4 = inlined_call_operand.hbm [shape: f32[2,128,384], index: 4, kind: input, shape index: {}]   ;;  %s2701_s5 = inlined_call_operand.vmem [shape: f32[2,1,384], index: 5, kind: input, shape index: {}]   ;;  %s2702_s6 = inlined_call_operand.vmem [shape: f32[2,1,128], index: 6, kind: input, shape index: {}]   ;;  %s2703_s7 = inlined_call_operand.hbm [shape: f32[1,8,128], index: 7, kind: output, shape index: {0}]   ;;  %s2704_s8 = inlined_call_operand.hbm [shape: f32[2,8,128], index: 8, kind: output, shape index: {1}, may-alias: {1,8}]  }
   0x1   :  { %2725 = sst [smem:[#allocation26_spill]] %s2697_s1 }
   0x2   :  { %2726 = sst [smem:[#allocation27_spill]] %s2699_s3 }
   0x3   :  { %2727 = sst [smem:[#allocation28_spill]] %s2700_s4 }
   0x4   :  { %14 = vsyncpa [#allocation6], 0 }
   0x5   :  { %16 = vsyncpa [#allocation6 + $0x1], 0 }
   0x6   :  { %17 = vsyncpa [#allocation9], 0 }
   0x7   :  { %18 = vsyncpa [#allocation7], 0 }
   0x8   :  { %19 = vsyncpa [#allocation14], 0 }
   0x9   :  { %21 = vsyncpa [#allocation14 + $0x1], 0  ;;  %s2177_s27 = smov 0   ;;  %s2179_s28 = smov 0  }
   0xa   :  { %s2181_s29 = smov 0   ;;  %s2183_s30 = smov 0  }
   0xb   :  { %s2185_s9 = smov 0   ;;  %s2187_s10 = smov 0  }
   0xc   :  { %s2189_s11 = smov 0   ;;  %s2191_s12 = smov 0  }
   0xd LB: > { %2728 = sst [smem:[#allocation21_spill]] %s2101_s9  ;;  %s2218_s13 = sadd.s32 4294967295, %s2113_s12   ;;  %s2113_s12 = sphi %s2191_s12, %s27_s12   ;;  %s2109_s11 = sphi %s2189_s11, %s2775_s11   ;;  %s2105_s10 = sphi %s2187_s10, %s2774_s10   ;;  %s2101_s9 = sphi %s2185_s9, %s2769_s9   ;;  %s2097_s30 = sphi %s2183_s30, %s2773_s30   ;;  %s2093_s29 = sphi %s2181_s29, %s2772_s29   ;;  %s2089_s28 = sphi %s2179_s28, %s2677_s28   ;;  %s2085_s27 = sphi %s2177_s27, %s2771_s27  }
   0xe   : > { %s1357_s14 = sadd.s32 4294967294, %s2113_s12   ;;  %s39_s15 = sadd.s32 1, %s2109_s11 }
   0xf   : > { %p41_p0 = scmp.ge.s32.totalorder %s39_s15, 2  ;;  %p83_p1 = scmp.ne.s32.totalorder %s2101_s9, %s2097_s30 }
  0x10   : > { %s76_s16 = sadd.s32 1, %s2101_s9  ;;  %p84_p2 = scmp.eq.s32.totalorder %s2113_s12, 0 }
  0x11   : > { %s2777_s15 = smov (%p41_p0, %s39_s15), 0  ;;  %p2711_p3 = scmp.ne.s32.totalorder %s2097_s30, %s2093_s29 }
  0x12   : > { %2729 = sst [smem:[#allocation22_spill]] %s2777_s15  ;;  %p2082_p4 = scmp.ne.s32.totalorder %s2089_s28, 0 }
  0x13   : > { %s73_s17 = ssub.s32 %s2109_s11, %s2777_s15  ;;  %p2236_p5 = por %p84_p2, %p83_p1 }
  0x14   : > { %p74_p6 = scmp.eq.s32.totalorder %s73_s17, 0  ;;  %p2240_p7 = por %p2082_p4, %p84_p2 }
  0x15   : > { %p2710_p8 = scmp.eq.s32.totalorder %s2218_s13, 1  ;;  %p276_p9 = scmp.eq.s32.totalorder %s1357_s14, 1 }
  0x16   : > { %s2246_s20 = scalar_select %p74_p6, %s2101_s9, %s76_s16  }
  0x17   : > { %p2253_p10 = por %p2710_p8, %p83_p1  ;;  %p2260_p11 = por %p276_p9, %p2711_p3 }
  0x18   : > { %2732 = sst [smem:[#allocation23_spill]] %s2246_s20  ;;  %p1750_p13 = scmp.lt.s32.totalorder %s2113_s12, 2 }
  0x19   : > { %s2733_s21 = scalar_select %p2253_p10, 1, 0 }
  0x1a   : > { %s2735_s22 = scalar_select %p2260_p11, 1, 0 }
  0x1b   : > { %2734 = sst [smem:[#allocation24_spill]] %s2733_s21  ;;  %s320_s23 = sand.u32 1, %s2113_s12  }
  0x1c   : > { %2736 = sst [smem:[#allocation25_spill]] %s2735_s22  ;;  %s322_s24 = sand.u32 1, %s2101_s9  }
  0x1d   : > { %s1364_s25 = sshll.u32 %s322_s24, 3  ;;  %s1365_s26 = sshll.u32 %s2109_s11, 7 }
  0x1e   : > { %s2737_s1 = sld [smem:[#allocation26_spill]]  ;;  %s324_s15 = scalar_lea.vmem [#allocation5], %s1364_s25 }
  0x1f   : > { %s331_s20 = sshll.u32 %s324_s15, 4  ;;  %p2276_p0 = pnand %p1750_p13, %p2236_p5  ;;  %s2280_s20 = int_to_ptr.vmem [resolvable:$true] %s331_s20 }
  0x20   : > { %p2284_p1 = pnand %p1750_p13, %p2240_p7  ;;  %s2290_s16 = scalar_lea.sflag [#allocation6], %s320_s23 }
  0x21   : > { %s2738_s22 = scalar_select %p2276_p0, 1, 0 }
  0x22   : > { %s2739_s14 = scalar_select %p2284_p1, 1, 0 }
  0x23   : > { %p2713_p4 = pneg %p2276_p0 }
  0x24   : > { %s2272_s17 = scalar_lea.hbm %s2737_s1, %s1365_s26  ;;  %s2288_s26 = smul.u32 384, %s322_s24 }
  0x25   : > { %s1850_s25 = scalar_lea.hbm %s2272_s17, 128  ;;  %s1855_s19 = scalar_lea.hbm %s2737_s1, 256 }
  0x26   : > { %p1851_p2 = scmp.ne.s32.totalorder %s2272_s17, %s1850_s25  ;;  %p1856_p7 = scmp.lt.u32.totalorder %s2272_s17, %s2737_s1 }
  0x27   : > { %p1857_p9 = scmp.lt.u32.totalorder %s1855_s19, %s1850_s25  ;;  %p1859_p12 = scmp.lt.u32.totalorder %s1850_s25, %s2272_s17 }
  0x28   : > { %p1853_p5 = pnand %p2713_p4, %p1851_p2 }
  0x29   : > { %p1858_p13 = por %p1857_p9, %p1856_p7 }
  0x2a   : > { %p1854_p6 = pneg %p1853_p5 }
  0x2b   : > { %p1860_p8 = por %p1859_p12, %p1858_p13 }
  0x2d   : > { %p1861_p3 = pnand %p1860_p8, %p1854_p6 }
  0x2f   : > { %1864 = shalt.err (!%p1861_p3)
}
  0x30   : > { %s1865_s23 = scalar_lea.vmem %s2280_s20, 128  ;;  %s2115_s24 = smov [#allocation5]  }
  0x31   : > { %p1866_p2 = scmp.ne.s32.totalorder %s2280_s20, %s1865_s23  ;;  %s1870_s15 = sshll.u32 %s2115_s24, 4  ;;  %s1871_s15 = int_to_ptr.vmem [resolvable:$false] %s1870_s15 }
  0x32   : > { %s1872_s9 = scalar_lea.vmem %s1871_s15, 256  ;;  %p1873_p10 = scmp.lt.s32.totalorder %s2280_s20, %s1871_s15 }
  0x33   : > { %p1868_p5 = pnand %p1866_p2, %p2713_p4  ;;  %p1874_p7 = scmp.lt.s32.totalorder %s1872_s9, %s1865_s23 }
  0x35   : > { %p1869_p11 = pneg %p1868_p5  ;;  %p1875_p9 = por %p1874_p7, %p1873_p10 }
  0x37   : > { %p1876_p12 = pnand %p1875_p9, %p1869_p11 }
  0x39   : > { %1879 = shalt.err (!%p1876_p12)
}
  0x3a   : > { %1738 = dma.hbm_to_vmem [thread:$0]  (!%p2276_p0), %s2272_s17, 128, %s2280_s20, %s2290_s16  }
  0x3b   : > { %s366_s21 = scalar_lea.vmem [#allocation11], %s2288_s26  ;;  %s2116_s18 = smov [#allocation10]  }
  0x3c   : > { %s2321_s25 = sshll.u32 %s366_s21, 4  ;;  %s352_s19 = sshll.u32 %s2116_s18, 4  ;;  %s353_s19 = int_to_ptr.vmem [resolvable:$true] %s352_s19  ;;  %s2370_s25 = int_to_ptr.vmem [resolvable:$true] %s2321_s25 }
  0x3d   : > { %s2740_s3 = sld [smem:[#allocation27_spill]]  ;;  %p1882_p10 = pneg %p2284_p1 }
  0x43   : > { %s1880_s15 = scalar_lea.hbm %s2740_s3, 6144 }
  0x44   : > { %p1881_p8 = scmp.ne.s32.totalorder %s2740_s3, %s1880_s15  ;;  %p1887_p13 = scmp.lt.u32.totalorder %s1880_s15, %s1880_s15 }
  0x45   : > { %p1889_p2 = scmp.lt.u32.totalorder %s1880_s15, %s2740_s3 }
  0x46   : > { %p1883_p11 = pnand %p1882_p10, %p1881_p8 }
  0x47   : > { %p1890_p5 = por %p1889_p2, %p1887_p13 }
  0x48   : > { %p1884_p6 = pneg %p1883_p11 }
  0x4a   : > { %p1891_p7 = pnand %p1890_p5, %p1884_p6 }
  0x4c   : > { %1894 = shalt.err (!%p1891_p7)
}
  0x4d   : > { %s1895_s26 = scalar_lea.vmem %s353_s19, 6144  ;;  %s1902_s21 = scalar_lea.vmem %s353_s19, 12288 }
  0x4e   : > { %p1896_p9 = scmp.ne.s32.totalorder %s353_s19, %s1895_s26  ;;  %p1903_p3 = scmp.lt.s32.totalorder %s353_s19, %s353_s19 }
  0x4f   : > { %p1904_p0 = scmp.lt.s32.totalorder %s1902_s21, %s1895_s26 }
  0x50   : > { %p1898_p12 = pnand %p1896_p9, %p1882_p10 }
  0x51   : > { %p1905_p1 = por %p1904_p0, %p1903_p3 }
  0x52   : > { %p1899_p4 = pneg %p1898_p12 }
  0x54   : > { %p1906_p8 = pnand %p1905_p1, %p1899_p4 }
  0x56   : > { %1909 = shalt.err (!%p1906_p8)
}
  0x57   : > { %s2717_s1 = smov 384   ;;  %s2721_s18 = smov 24  }
  0x58   : > { %p2741_p10 = scmp.ne.s32.totalorder %s2739_s14, 0  ;;  %p2719_p0 = scmp.eq.s32.totalorder %s2218_s13, 0 }
  0x59   : > { %p1360_p1 = scmp.ge.s32.totalorder %s2113_s12, 1  ;;  %p283_p4 = scmp.lt.s32.totalorder %s2113_s12, 3 }
  0x5a   : > { %1741 = dma.hbm_to_vmem [thread:$0]  (!%p2741_p10), %s2740_s3, 6144, %s353_s19, %s2290_s16, %s2717_s1, %s2717_s1, %s2721_s18  }
  0x5b   : > { %p2742_p3 = scmp.ne.s32.totalorder %s2097_s30, %s2093_s29  ;;  %p2744_p6 = scmp.ne.s32.totalorder %s2089_s28, %s2085_s27 }
  0x5c   : > { %p2364_p2 = pnand %p1360_p1, %p283_p4  ;;  %s2119_s19 = smov [#allocation8]  }
  0x5d   : > { %p2351_p11 = por %p2719_p0, %p2742_p3  ;;  %p2360_p13 = por %p2744_p6, %p2719_p0 }
  0x5e   : > { %s2746_s9 = scalar_select %p2364_p2, 1, 0 }
  0x5f   : > { %s2743_s15 = scalar_select %p2351_p11, 1, 0 }
  0x60   : > { %s2745_s14 = scalar_select %p2360_p13, 1, 0 }
  0x61   : > { %s295_s20 = sshll.u32 %s2119_s19, 4  ;;  %s1711_s17 = smul.u32 6144, %s2109_s11  ;;  %s2379_s20 = int_to_ptr.vmem [resolvable:$true] %s295_s20 }
  0x62   : > { %p1731_p5 = pneg %p2364_p2  ;;  %s2747_s4 = sld [smem:[#allocation28_spill]] }
  0x63   : > { %p2749_p12 = scmp.ne.s32.totalorder %s2738_s22, 0 }
  0x64   : > { %p2383_p7 = pnand %p1731_p5, %p2719_p0 }
  0x65   : > { %p2750_p8 = pneg %p2749_p12 }
  0x68   : > { %s2377_s27 = scalar_lea.hbm %s2747_s4, %s1711_s17  ;;  %s1915_s26 = scalar_lea.hbm %s2747_s4, 12288 }
  0x69   : > { %s1910_s24 = scalar_lea.hbm %s2377_s27, 6144  ;;  %p1916_p4 = scmp.lt.u32.totalorder %s2377_s27, %s2747_s4 }
  0x6a   : > { %p1911_p9 = scmp.ne.s32.totalorder %s2377_s27, %s1910_s24  ;;  %p1917_p3 = scmp.lt.u32.totalorder %s1915_s26, %s1910_s24 }
  0x6b   : > { %p1919_p5 = scmp.lt.u32.totalorder %s1910_s24, %s2377_s27 }
  0x6c   : > { %p1913_p10 = pnand %p1911_p9, %p2750_p8  ;;  %p1918_p6 = por %p1917_p3, %p1916_p4 }
  0x6e   : > { %p1914_p1 = pneg %p1913_p10  ;;  %p1920_p0 = por %p1919_p5, %p1918_p6 }
  0x70   : > { %p1921_p13 = pnand %p1920_p0, %p1914_p1 }
  0x72   : > { %1924 = shalt.err (!%p1921_p13)
}
  0x73   : > { %s1925_s18 = scalar_lea.vmem %s2370_s25, 6144  ;;  %s2120_s19 = smov [#allocation11]  }
  0x74   : > { %p1926_p9 = scmp.ne.s32.totalorder %s2370_s25, %s1925_s18  ;;  %s1930_s17 = sshll.u32 %s2120_s19, 4  ;;  %s1931_s17 = int_to_ptr.vmem [resolvable:$false] %s1930_s17 }
  0x75   : > { %s1932_s1 = scalar_lea.vmem %s1931_s17, 12288  ;;  %p1933_p2 = scmp.lt.s32.totalorder %s2370_s25, %s1931_s17 }
  0x76   : > { %p1928_p10 = pnand %p1926_p9, %p2750_p8  ;;  %p1934_p4 = scmp.lt.s32.totalorder %s1932_s1, %s1925_s18 }
  0x78   : > { %p1929_p11 = pneg %p1928_p10  ;;  %p1935_p3 = por %p1934_p4, %p1933_p2 }
  0x7a   : > { %p1936_p6 = pnand %p1935_p3, %p1929_p11 }
  0x7c   : > { %1939 = shalt.err (!%p1936_p6)
}
  0x7d   : > { %s2751_s24 = smov 24   ;;  %s2752_s26 = smov 384  }
  0x7e   : > { %1744 = dma.hbm_to_vmem [thread:$0]  (!%p2749_p12), %s2377_s27, 6144, %s2370_s25, %s2290_s16, %s2752_s26, %s2752_s26, %s2751_s24  }
  0x7f   : > { %s1940_s19 = scalar_lea.hbm %s2698_s2, 6144  ;;  %p1942_p11 = pneg %p2383_p7 }
  0x80   : > { %p1941_p0 = scmp.ne.s32.totalorder %s2698_s2, %s1940_s19  ;;  %p1947_p1 = scmp.lt.u32.totalorder %s1940_s19, %s2698_s2 }
  0x82   : > { %p1943_p13 = pnand %p1942_p11, %p1941_p0 }
  0x84   : > { %p1944_p2 = pneg %p1943_p13 }
  0x86   : > { %p1949_p5 = pnand %p1947_p1, %p1944_p2 }
  0x88   : > { %1952 = shalt.err (!%p1949_p5)
}
  0x89   : > { %s1953_s16 = scalar_lea.vmem %s2379_s20, 6144  ;;  %p1961_p10 = scmp.lt.s32.totalorder %s2379_s20, %s2379_s20 }
  0x8a   : > { %p1954_p12 = scmp.ne.s32.totalorder %s2379_s20, %s1953_s16  ;;  %p1962_p4 = scmp.lt.s32.totalorder %s1953_s16, %s1953_s16 }
  0x8c   : > { %p1956_p9 = pnand %p1954_p12, %p1942_p11  ;;  %p1963_p3 = por %p1962_p4, %p1961_p10 }
  0x8e   : > { %p1957_p8 = pneg %p1956_p9 }
  0x90   : > { %p1964_p6 = pnand %p1963_p3, %p1957_p8 }
  0x92   : > { %1967 = shalt.err (!%p1964_p6)
}
  0x93   : > { %1734 = dma.hbm_to_vmem [thread:$0]  (!%p2383_p7), %s2698_s2, 6144, %s2379_s20, [#allocation9], %s2752_s26, %s2752_s26, %s2751_s24  }
  0x94   : > { %p2753_p0 = scmp.ne.s32.totalorder %s2746_s9, 0 }
  0x95   : > { %s400_s25 = sand.u32 (!%p2753_p0), 1, %s2218_s13   ;;  %s2442_s27 = sand.u32 (!%p2753_p0), 1, %s2097_s30  }
  0x96   : > { %398 = sbr.rel (%p2753_p0) target bundleno = 1013 (0x3f5), region = 48  ;;  %s1370_s1 = sshll.u32 (!%p2753_p0), %s2442_s27, 3 }
  0x97   : > { %s401_s23 = scalar_lea.sflag (!%p2753_p0), [#allocation6], %s400_s25  ;;  %s404_s21 = scalar_lea.vmem (!%p2753_p0), [#allocation5], %s1370_s1 }
  0x98   : > { %p2754_p11 = scmp.ne.s32.totalorder (!%p2753_p0), %s2743_s15, 0 }
  0x9d   : > { %2059 = dma.done.wait (%p2754_p11), %s401_s23, 128  }
  0x9e   : > { %2061 = vsyncadd (%p2754_p11), %s401_s23, 4294967168  ;;  %p2755_p7 = scmp.eq.s32.totalorder %s2218_s13, 0 }
  0xa0   : > { %2063 = dma.done.wait (%p2755_p7), [#allocation9], 6144   ;;  %p2756_p13 = pmov %p2755_p7 }
  0xa1   : > { %s415_s9 = sand.u32 1, %s2089_s28   ;;  %p2757_p2 = scmp.ne.s32.totalorder %s2745_s14, 0 }
  0xa2   : > { %2065 = vsyncadd (%p2756_p13), [#allocation9], 4294961152  ;;  %s1712_s20 = smul.u32 384, %s415_s9 }
  0xa4   : > { %s2454_s24 = scalar_lea.vmem [#allocation10], %s1712_s20 }
  0xa5   : > { %2067 = dma.done.wait (%p2757_p2), %s401_s23, 6144  }
  0xa6   : > { %2069 = vsyncadd (%p2757_p2), %s401_s23, 4294961152  ;;  %s1713_s26 = smul.u32 384, %s2442_s27 }
  0xa8   : > { %s2461_s19 = scalar_lea.vmem [#allocation11], %s1713_s26 }
  0xa9   : > { %2071 = dma.done.wait (%p2754_p11), %s401_s23, 6144  }
  0xaa   : > { %2073 = vsyncadd (%p2754_p11), %s401_s23, 4294961152  ;;  %p493_p1 = scmp.lt.s32.totalorder %s2105_s10, 1  ;;  %v504_v0 = vld [vmem:[%s404_s21] sm:$0xff]  ;;  %s2481_s15 = scalar_lea.vmem [#allocation13], %s1370_s1 }
  0xab   : > { %505 = vst [vmem:[#allocation3] sm:$0xff] %v504_v0  ;;  %p1373_p5 = scmp.ne.s32.totalorder %s2105_s10, 0 }
  0xac   : > { %s2469_s17 = scalar_select %p493_p1, %s2105_s10, 1 }
  0xad   : > { %509 = sbr.rel (%p1373_p5) target bundleno = 422 (0x1a6), region = 72  ;;  %v512_v1 = vld [vmem:[#allocation8 + $0x8] sm:$0xff] (!%p1373_p5)  ;;  %v515_v2 = vld [vmem:[#allocation8 + $0x20] sm:$0xff] (!%p1373_p5)  ;;  %v2121_v5 = vmov (!%p1373_p5), 0.0|0.0   ;;  %v514_v6 = vld [vmem:[#allocation8 + $0x18] sm:$0xff] (!%p1373_p5)  ;;  %v2122_v9 = vmov (!%p1373_p5), 0.0  }
  0xae   : > { %s1714_s22 = smul.u32 3, %s2469_s17  ;;  %s499_s16 = scalar_lea.vmem %s2702_s6, %s2469_s17  ;;  %v511_v3 = vld [vmem:[#allocation8] sm:$0xff] (!%p1373_p5)  ;;  %v1540_v4 = vpack.c.bf16 (!%p1373_p5), %v515_v2, %v512_v1  ;;  %1572 = vmatprep.subr.bf16.mxu1 (!%p1373_p5), %v2121_v5  ;;  %v513_v7 = vld [vmem:[#allocation8 + $0x10] sm:$0xff] (!%p1373_p5)  ;;  %v516_v8 = vld [vmem:[#allocation8 + $0x28] sm:$0xff] (!%p1373_p5)  ;;  %623 = vmatprep.mubr.f32.mxu0 (!%p1373_p5), %v2122_v9  ;;  %vm2123_vm0 = vmmov (!%p1373_p5), 0  }
  0xaf   : > { %v1542_v10 = vpack.c.bf16 (!%p1373_p5), %v514_v6, %v511_v3  ;;  %v1573_v11 = vpack.c.bf16 (!%p1373_p5), %v516_v8, %v513_v7  ;;  %v518_v12 = vld [vmem:[#allocation8 + $0x38] sm:$0xff] (!%p1373_p5)  ;;  %v521_v13 = vld [vmem:[#allocation8 + $0x50] sm:$0xff] (!%p1373_p5)  ;;  %1467 = vmatprep.mubr.msk.f32.mxu1 (!%p1373_p5), %vm2123_vm0, %v2122_v9  ;;  %v520_v16 = vld [vmem:[#allocation8 + $0x48] sm:$0xff] (!%p1373_p5) }
  0xb0   : > { %s2479_s25 = scalar_lea.vmem %s2701_s5, %s1714_s22  ;;  %v517_v14 = vld [vmem:[#allocation8 + $0x30] sm:$0xff] (!%p1373_p5)  ;;  %1541 = vmatprep.subr.bf16.mxu0 (!%p1373_p5), %v1540_v4  ;;  %v1544_v15 = vpack.c.bf16 (!%p1373_p5), %v521_v13, %v518_v12  ;;  %v519_v17 = vld [vmem:[#allocation8 + $0x40] sm:$0xff] (!%p1373_p5)  ;;  %v522_v18 = vld [vmem:[#allocation8 + $0x58] sm:$0xff] (!%p1373_p5) }
  0xb1   : > { %1543 = vmatpush1.bf16.msra.mxu0 (!%p1373_p5), %v1542_v10  ;;  %1574 = vmatpush3.bf16.msra.mxu1 (!%p1373_p5), %v1573_v11  ;;  %v1546_v19 = vpack.c.bf16 (!%p1373_p5), %v520_v16, %v517_v14  ;;  %v1576_v20 = vpack.c.bf16 (!%p1373_p5), %v522_v18, %v519_v17  ;;  %v524_v21 = vld [vmem:[#allocation8 + $0x68] sm:$0xff] (!%p1373_p5)  ;;  %v527_v22 = vld [vmem:[#allocation8 + $0x80] sm:$0xff] (!%p1373_p5)  ;;  %v526_v25 = vld [vmem:[#allocation8 + $0x78] sm:$0xff] (!%p1373_p5) }
  0xb2   : > { %v523_v23 = vld [vmem:[#allocation8 + $0x60] sm:$0xff] (!%p1373_p5)  ;;  %1545 = vmatprep.subr.bf16.mxu0 (!%p1373_p5), %v1544_v15  ;;  %1575 = vmatprep.subr.bf16.mxu1 (!%p1373_p5), %v2121_v5  ;;  %v1548_v24 = vpack.c.bf16 (!%p1373_p5), %v527_v22, %v524_v21  ;;  %v525_v26 = vld [vmem:[#allocation8 + $0x70] sm:$0xff] (!%p1373_p5)  ;;  %v528_v27 = vld [vmem:[#allocation8 + $0x88] sm:$0xff] (!%p1373_p5) }
  0xb3   : > { %v530_v28 = vld [vmem:[#allocation8 + $0x98] sm:$0xff] (!%p1373_p5)  ;;  %v533_v29 = vld [vmem:[#allocation8 + $0xb0] sm:$0xff] (!%p1373_p5)  ;;  %v1550_v30 = vpack.c.bf16 (!%p1373_p5), %v526_v25, %v523_v23  ;;  %v1579_v31 = vpack.c.bf16 (!%p1373_p5), %v528_v27, %v525_v26  ;;  %v532_v34 = vld [vmem:[#allocation8 + $0xa8] sm:$0xff] (!%p1373_p5) }
  0xb4   : > { %v529_v32 = vld [vmem:[#allocation8 + $0x90] sm:$0xff]  ;;  %v1552_v33 = vpack.c.bf16 %v533_v29, %v530_v28  ;;  %v531_v35 = vld [vmem:[#allocation8 + $0xa0] sm:$0xff]  ;;  %v534_v36 = vld [vmem:[#allocation8 + $0xb8] sm:$0xff] }
  0xb5   : > { %1547 = vmatpush1.bf16.msra.mxu0 %v1546_v19  ;;  %1577 = vmatpush3.bf16.msra.mxu1 %v1576_v20  ;;  %v536_v37 = vld [vmem:[#allocation8 + $0xc8] sm:$0xff]  ;;  %v539_v38 = vld [vmem:[#allocation8 + $0xe0] sm:$0xff]  ;;  %v1554_v39 = vpack.c.bf16 %v532_v34, %v529_v32  ;;  %v1582_v40 = vpack.c.bf16 %v534_v36, %v531_v35  ;;  %v538_v43 = vld [vmem:[#allocation8 + $0xd8] sm:$0xff] }
  0xb6   : > { %1549 = vmatprep.subr.bf16.mxu0 %v1548_v24  ;;  %1578 = vmatprep.subr.bf16.mxu1 %v2121_v5  ;;  %v535_v41 = vld [vmem:[#allocation8 + $0xc0] sm:$0xff]  ;;  %v1556_v42 = vpack.c.bf16 %v539_v38, %v536_v37  ;;  %v537_v44 = vld [vmem:[#allocation8 + $0xd0] sm:$0xff]  ;;  %v540_v45 = vld [vmem:[#allocation8 + $0xe8] sm:$0xff] }
  0xb7   : > { %v542_v46 = vld [vmem:[#allocation8 + $0xf8] sm:$0xff]  ;;  %v545_v47 = vld [vmem:[#allocation8 + $0x110] sm:$0xff]  ;;  %v1558_v48 = vpack.c.bf16 %v538_v43, %v535_v41  ;;  %v1585_v49 = vpack.c.bf16 %v540_v45, %v537_v44  ;;  %v544_v52 = vld [vmem:[#allocation8 + $0x108] sm:$0xff] }
  0xb8   : > { %v541_v50 = vld [vmem:[#allocation8 + $0xf0] sm:$0xff]  ;;  %v1560_v51 = vpack.c.bf16 %v545_v47, %v542_v46  ;;  %v543_v53 = vld [vmem:[#allocation8 + $0x100] sm:$0xff]  ;;  %v546_v54 = vld [vmem:[#allocation8 + $0x118] sm:$0xff] }
  0xb9   : > { %1551 = vmatpush1.bf16.msra.mxu0 %v1550_v30  ;;  %1580 = vmatpush3.bf16.msra.mxu1 %v1579_v31  ;;  %v548_v55 = vld [vmem:[#allocation8 + $0x128] sm:$0xff]  ;;  %v551_v56 = vld [vmem:[#allocation8 + $0x140] sm:$0xff]  ;;  %v1562_v57 = vpack.c.bf16 %v544_v52, %v541_v50  ;;  %v1588_v58 = vpack.c.bf16 %v546_v54, %v543_v53  ;;  %v550_v61 = vld [vmem:[#allocation8 + $0x138] sm:$0xff] }
  0xba   : > { %1553 = vmatprep.subr.bf16.mxu0 %v1552_v33  ;;  %1581 = vmatprep.subr.bf16.mxu1 %v2121_v5  ;;  %v547_v59 = vld [vmem:[#allocation8 + $0x120] sm:$0xff]  ;;  %v1564_v60 = vpack.c.bf16 %v551_v56, %v548_v55  ;;  %v549_v62 = vld [vmem:[#allocation8 + $0x130] sm:$0xff]  ;;  %v552_v63 = vld [vmem:[#allocation8 + $0x148] sm:$0xff] }
  0xbb   : > { %v554_v0 = vld [vmem:[#allocation8 + $0x158] sm:$0xff]  ;;  %v557_v1 = vld [vmem:[#allocation8 + $0x170] sm:$0xff]  ;;  %v1566_v2 = vpack.c.bf16 %v550_v61, %v547_v59  ;;  %v1591_v3 = vpack.c.bf16 %v552_v63, %v549_v62  ;;  %v556_v7 = vld [vmem:[#allocation8 + $0x168] sm:$0xff] }
  0xbc   : > { %v553_v4 = vld [vmem:[#allocation8 + $0x150] sm:$0xff]  ;;  %v1568_v6 = vpack.c.bf16 %v557_v1, %v554_v0  ;;  %v555_v8 = vld [vmem:[#allocation8 + $0x160] sm:$0xff]  ;;  %v558_v9 = vld [vmem:[#allocation8 + $0x178] sm:$0xff] }
  0xbd   : > { %1555 = vmatpush1.bf16.msra.mxu0 %v1554_v39  ;;  %1583 = vmatpush3.bf16.msra.mxu1 %v1582_v40  ;;  %v1570_v10 = vpack.c.bf16 %v556_v7, %v553_v4  ;;  %v1594_v11 = vpack.c.bf16 %v558_v9, %v555_v8  ;;  %v510_v12 = vld [vmem:[%s2696_s0] sm:$0xff] }
  0xbe   : > { %1557 = vmatprep.subr.bf16.mxu0 %v1556_v42  ;;  %1584 = vmatprep.subr.bf16.mxu1 %v2121_v5 }
  0xc1   : > { %1559 = vmatpush1.bf16.msra.mxu0 %v1558_v48  ;;  %1586 = vmatpush3.bf16.msra.mxu1 %v1585_v49 }
  0xc2   : > { %1561 = vmatprep.subr.bf16.mxu0 %v1560_v51  ;;  %1587 = vmatprep.subr.bf16.mxu1 %v2121_v5 }
  0xc5   : > { %1563 = vmatpush1.bf16.msra.mxu0 %v1562_v57  ;;  %1589 = vmatpush3.bf16.msra.mxu1 %v1588_v58 }
  0xc6   : > { %1565 = vmatprep.subr.bf16.mxu0 %v1564_v60  ;;  %1590 = vmatprep.subr.bf16.mxu1 %v2121_v5 }
  0xc9   : > { %1567 = vmatpush1.bf16.msra.mxu0 %v1566_v2  ;;  %1592 = vmatpush3.bf16.msra.mxu1 %v1591_v3 }
  0xca   : > { %1569 = vmatprep.subr.bf16.mxu0 %v1568_v6  ;;  %1593 = vmatprep.subr.bf16.mxu1 %v2121_v5 }
  0xcd   : > { %1571 = vmatpush1.bf16.msra.mxu0 %v1570_v10  ;;  %1595 = vmatpush3.bf16.msra.mxu1 %v1594_v11 }
  0xd0   : > { %624 = vmatmul.mubr.f32.vlgmr.msra.gmra.mrb[0].mxu0 %v510_v12  ;;  %1468 = vmatmul.mubr.f32.vlgmr.msra.gmra.mrb[0].mxu1 %v510_v12 }
 0x1a3   : > { %v625_v13 = vpop.f32.mrb[0].mxu0  ;;  %v696_v14 = vpop.f32.mrb[0].mxu1 }
 0x1a4   : > { %700 = vst [vmem:[#allocation4] sm:$0xff] %v625_v13  ;;  %702 = vst [vmem:[#allocation4 + $0x10] sm:$0xff] %v696_v14  ;;  %v627_v15 = vpop.f32.mrb[1].mxu0  ;;  %v1469_v16 = vpop.f32.mrb[1].mxu1 }
 0x1a5   : > { %701 = vst [vmem:[#allocation4 + $0x8] sm:$0xff] %v627_v15 }
 0x1a6 PF: > { %p1374_p12 = scmp.le.s32.totalorder %s2105_s10, 0 }
 0x1a7   : > { %v711_v5 = vld [vmem:[%s2454_s24 + $0x8] sm:$0xff] (!%p1374_p12)  ;;  %v714_v17 = vld [vmem:[%s2454_s24 + $0x20] sm:$0xff] (!%p1374_p12)  ;;  %v2124_v20 = vmov (!%p1374_p12), 0.0|0.0   ;;  %v713_v21 = vld [vmem:[%s2454_s24 + $0x18] sm:$0xff] (!%p1374_p12)  ;;  %v2125_v24 = vmov (!%p1374_p12), 0.0   ;;  %vm2126_vm1 = vmmov (!%p1374_p12), 0  }
 0x1a8   : > { %706 = sbr.rel (%p1374_p12) target bundleno = 672 (0x2a0), region = 76  ;;  %v710_v18 = vld [vmem:[%s2454_s24] sm:$0xff] (!%p1374_p12)  ;;  %v1596_v19 = vpack.c.bf16 (!%p1374_p12), %v714_v17, %v711_v5  ;;  %1628 = vmatprep.subr.bf16.mxu1 (!%p1374_p12), %v2124_v20  ;;  %v712_v22 = vld [vmem:[%s2454_s24 + $0x10] sm:$0xff] (!%p1374_p12)  ;;  %v715_v23 = vld [vmem:[%s2454_s24 + $0x28] sm:$0xff] (!%p1374_p12)  ;;  %822 = vmatprep.mubr.f32.mxu0 (!%p1374_p12), %v2125_v24 }
 0x1a9   : > { %v1598_v25 = vpack.c.bf16 (!%p1374_p12), %v713_v21, %v710_v18  ;;  %v1629_v26 = vpack.c.bf16 (!%p1374_p12), %v715_v23, %v712_v22  ;;  %v717_v27 = vld [vmem:[%s2454_s24 + $0x38] sm:$0xff] (!%p1374_p12)  ;;  %v720_v28 = vld [vmem:[%s2454_s24 + $0x50] sm:$0xff] (!%p1374_p12)  ;;  %1502 = vmatprep.mubr.msk.f32.mxu1 (!%p1374_p12), %vm2126_vm1, %v2125_v24  ;;  %v719_v31 = vld [vmem:[%s2454_s24 + $0x48] sm:$0xff] (!%p1374_p12) }
 0x1aa   : > { %v716_v29 = vld [vmem:[%s2454_s24 + $0x30] sm:$0xff] (!%p1374_p12)  ;;  %1597 = vmatprep.subr.bf16.mxu0 (!%p1374_p12), %v1596_v19  ;;  %v1600_v30 = vpack.c.bf16 (!%p1374_p12), %v720_v28, %v717_v27  ;;  %v718_v32 = vld [vmem:[%s2454_s24 + $0x40] sm:$0xff] (!%p1374_p12)  ;;  %v721_v33 = vld [vmem:[%s2454_s24 + $0x58] sm:$0xff] (!%p1374_p12) }
 0x1ab   : > { %1599 = vmatpush1.bf16.msra.mxu0 (!%p1374_p12), %v1598_v25  ;;  %1630 = vmatpush3.bf16.msra.mxu1 (!%p1374_p12), %v1629_v26  ;;  %v1602_v34 = vpack.c.bf16 (!%p1374_p12), %v719_v31, %v716_v29  ;;  %v1632_v35 = vpack.c.bf16 (!%p1374_p12), %v721_v33, %v718_v32  ;;  %v723_v36 = vld [vmem:[%s2454_s24 + $0x68] sm:$0xff] (!%p1374_p12)  ;;  %v726_v37 = vld [vmem:[%s2454_s24 + $0x80] sm:$0xff] (!%p1374_p12)  ;;  %v725_v40 = vld [vmem:[%s2454_s24 + $0x78] sm:$0xff] (!%p1374_p12) }
 0x1ac   : > { %v722_v38 = vld [vmem:[%s2454_s24 + $0x60] sm:$0xff] (!%p1374_p12)  ;;  %1601 = vmatprep.subr.bf16.mxu0 (!%p1374_p12), %v1600_v30  ;;  %1631 = vmatprep.subr.bf16.mxu1 (!%p1374_p12), %v2124_v20  ;;  %v1604_v39 = vpack.c.bf16 (!%p1374_p12), %v726_v37, %v723_v36  ;;  %v724_v41 = vld [vmem:[%s2454_s24 + $0x70] sm:$0xff] (!%p1374_p12)  ;;  %v727_v42 = vld [vmem:[%s2454_s24 + $0x88] sm:$0xff] (!%p1374_p12) }
 0x1ad   : > { %v729_v43 = vld [vmem:[%s2454_s24 + $0x98] sm:$0xff] (!%p1374_p12)  ;;  %v732_v44 = vld [vmem:[%s2454_s24 + $0xb0] sm:$0xff] (!%p1374_p12)  ;;  %v1606_v45 = vpack.c.bf16 (!%p1374_p12), %v725_v40, %v722_v38  ;;  %v1635_v46 = vpack.c.bf16 (!%p1374_p12), %v727_v42, %v724_v41  ;;  %v731_v49 = vld [vmem:[%s2454_s24 + $0xa8] sm:$0xff] (!%p1374_p12) }
 0x1ae   : > { %v728_v47 = vld [vmem:[%s2454_s24 + $0x90] sm:$0xff] (!%p1374_p12)  ;;  %v1608_v48 = vpack.c.bf16 (!%p1374_p12), %v732_v44, %v729_v43  ;;  %v730_v50 = vld [vmem:[%s2454_s24 + $0xa0] sm:$0xff] (!%p1374_p12)  ;;  %v733_v51 = vld [vmem:[%s2454_s24 + $0xb8] sm:$0xff] (!%p1374_p12) }
 0x1af   : > { %1603 = vmatpush1.bf16.msra.mxu0 %v1602_v34  ;;  %1633 = vmatpush3.bf16.msra.mxu1 %v1632_v35  ;;  %v735_v52 = vld [vmem:[%s2454_s24 + $0xc8] sm:$0xff]  ;;  %v738_v53 = vld [vmem:[%s2454_s24 + $0xe0] sm:$0xff]  ;;  %v1610_v54 = vpack.c.bf16 %v731_v49, %v728_v47  ;;  %v1638_v55 = vpack.c.bf16 %v733_v51, %v730_v50  ;;  %v737_v58 = vld [vmem:[%s2454_s24 + $0xd8] sm:$0xff] }
 0x1b0   : > { %1605 = vmatprep.subr.bf16.mxu0 %v1604_v39  ;;  %1634 = vmatprep.subr.bf16.mxu1 %v2124_v20  ;;  %v734_v56 = vld [vmem:[%s2454_s24 + $0xc0] sm:$0xff]  ;;  %v1612_v57 = vpack.c.bf16 %v738_v53, %v735_v52  ;;  %v736_v59 = vld [vmem:[%s2454_s24 + $0xd0] sm:$0xff]  ;;  %v739_v60 = vld [vmem:[%s2454_s24 + $0xe8] sm:$0xff] }
 0x1b1   : > { %v741_v61 = vld [vmem:[%s2454_s24 + $0xf8] sm:$0xff]  ;;  %v744_v62 = vld [vmem:[%s2454_s24 + $0x110] sm:$0xff]  ;;  %v1614_v63 = vpack.c.bf16 %v737_v58, %v734_v56  ;;  %v1641_v0 = vpack.c.bf16 %v739_v60, %v736_v59  ;;  %v743_v3 = vld [vmem:[%s2454_s24 + $0x108] sm:$0xff] }
 0x1b2   : > { %v740_v1 = vld [vmem:[%s2454_s24 + $0xf0] sm:$0xff]  ;;  %v1616_v2 = vpack.c.bf16 %v744_v62, %v741_v61  ;;  %v742_v4 = vld [vmem:[%s2454_s24 + $0x100] sm:$0xff]  ;;  %v745_v6 = vld [vmem:[%s2454_s24 + $0x118] sm:$0xff] }
 0x1b3   : > { %1607 = vmatpush1.bf16.msra.mxu0 %v1606_v45  ;;  %1636 = vmatpush3.bf16.msra.mxu1 %v1635_v46  ;;  %v747_v7 = vld [vmem:[%s2454_s24 + $0x128] sm:$0xff]  ;;  %v750_v8 = vld [vmem:[%s2454_s24 + $0x140] sm:$0xff]  ;;  %v1618_v9 = vpack.c.bf16 %v743_v3, %v740_v1  ;;  %v1644_v10 = vpack.c.bf16 %v745_v6, %v742_v4  ;;  %v749_v13 = vld [vmem:[%s2454_s24 + $0x138] sm:$0xff] }
 0x1b4   : > { %1609 = vmatprep.subr.bf16.mxu0 %v1608_v48  ;;  %1637 = vmatprep.subr.bf16.mxu1 %v2124_v20  ;;  %v746_v11 = vld [vmem:[%s2454_s24 + $0x120] sm:$0xff]  ;;  %v1620_v12 = vpack.c.bf16 %v750_v8, %v747_v7  ;;  %v748_v14 = vld [vmem:[%s2454_s24 + $0x130] sm:$0xff]  ;;  %v751_v15 = vld [vmem:[%s2454_s24 + $0x148] sm:$0xff] }
 0x1b5   : > { %v753_v16 = vld [vmem:[%s2454_s24 + $0x158] sm:$0xff]  ;;  %v756_v5 = vld [vmem:[%s2454_s24 + $0x170] sm:$0xff]  ;;  %v1622_v17 = vpack.c.bf16 %v749_v13, %v746_v11  ;;  %v1647_v18 = vpack.c.bf16 %v751_v15, %v748_v14  ;;  %v755_v22 = vld [vmem:[%s2454_s24 + $0x168] sm:$0xff] }
 0x1b6   : > { %v752_v19 = vld [vmem:[%s2454_s24 + $0x150] sm:$0xff]  ;;  %v1624_v21 = vpack.c.bf16 %v756_v5, %v753_v16  ;;  %v754_v23 = vld [vmem:[%s2454_s24 + $0x160] sm:$0xff]  ;;  %v757_v24 = vld [vmem:[%s2454_s24 + $0x178] sm:$0xff] }
 0x1b7   : > { %1611 = vmatpush1.bf16.msra.mxu0 %v1610_v54  ;;  %1639 = vmatpush3.bf16.msra.mxu1 %v1638_v55  ;;  %v1626_v25 = vpack.c.bf16 %v755_v22, %v752_v19  ;;  %v1650_v26 = vpack.c.bf16 %v757_v24, %v754_v23  ;;  %v709_v27 = vld [vmem:[#allocation2] sm:$0xff] }
 0x1b8   : > { %1613 = vmatprep.subr.bf16.mxu0 %v1612_v57  ;;  %1640 = vmatprep.subr.bf16.mxu1 %v2124_v20 }
 0x1bb   : > { %1615 = vmatpush1.bf16.msra.mxu0 %v1614_v63  ;;  %1642 = vmatpush3.bf16.msra.mxu1 %v1641_v0 }
 0x1bc   : > { %1617 = vmatprep.subr.bf16.mxu0 %v1616_v2  ;;  %1643 = vmatprep.subr.bf16.mxu1 %v2124_v20 }
 0x1bf   : > { %1619 = vmatpush1.bf16.msra.mxu0 %v1618_v9  ;;  %1645 = vmatpush3.bf16.msra.mxu1 %v1644_v10 }
 0x1c0   : > { %1621 = vmatprep.subr.bf16.mxu0 %v1620_v12  ;;  %1646 = vmatprep.subr.bf16.mxu1 %v2124_v20 }
 0x1c3   : > { %1623 = vmatpush1.bf16.msra.mxu0 %v1622_v17  ;;  %1648 = vmatpush3.bf16.msra.mxu1 %v1647_v18 }
 0x1c4   : > { %1625 = vmatprep.subr.bf16.mxu0 %v1624_v21  ;;  %1649 = vmatprep.subr.bf16.mxu1 %v2124_v20 }
 0x1c7   : > { %1627 = vmatpush1.bf16.msra.mxu0 %v1626_v25  ;;  %1651 = vmatpush3.bf16.msra.mxu1 %v1650_v26 }
 0x1ca   : > { %823 = vmatmul.mubr.f32.vlgmr.msra.gmra.mrb[0].mxu0 %v709_v27  ;;  %1503 = vmatmul.mubr.f32.vlgmr.msra.gmra.mrb[0].mxu1 %v709_v27 }
 0x29d   : > { %v824_v28 = vpop.f32.mrb[0].mxu0  ;;  %v895_v29 = vpop.f32.mrb[0].mxu1 }
 0x29e   : > { %899 = vst [vmem:[#allocation4] sm:$0xff] %v824_v28  ;;  %901 = vst [vmem:[#allocation4 + $0x10] sm:$0xff] %v895_v29  ;;  %v826_v30 = vpop.f32.mrb[1].mxu0  ;;  %v1504_v31 = vpop.f32.mrb[1].mxu1 }
 0x29f   : > { %900 = vst [vmem:[#allocation4 + $0x8] sm:$0xff] %v826_v30 }
 0x2a0 PF: > { %v927_v20 = vld [vmem:[%s2461_s19 + $0x8] sm:$0xff]  ;;  %v930_v32 = vld [vmem:[%s2461_s19 + $0x20] sm:$0xff]  ;;  %v929_v35 = vld [vmem:[%s2461_s19 + $0x18] sm:$0xff]  ;;  %v2127_v38 = vmov 0.0|0.0   ;;  %v2128_v39 = vmov 0.0   ;;  %vm2129_vm2 = vmmov 0  }
 0x2a1   : > { %v926_v33 = vld [vmem:[%s2461_s19] sm:$0xff]  ;;  %v1652_v34 = vpack.c.bf16 %v930_v32, %v927_v20  ;;  %v933_v36 = vld [vmem:[%s2461_s19 + $0x38] sm:$0xff]  ;;  %v936_v37 = vld [vmem:[%s2461_s19 + $0x50] sm:$0xff]  ;;  %1684 = vmatprep.subr.bf16.mxu1 %v2127_v38  ;;  %1038 = vmatprep.mubr.f32.mxu0 %v2128_v39  ;;  %s2130_s20 = smov [#allocation12]   ;;  %s1380_s26 = sshll.u32 %s2105_s10, 7 }
 0x2a2   : > { %v1654_v40 = vpack.c.bf16 %v929_v35, %v926_v33  ;;  %v1656_v41 = vpack.c.bf16 %v936_v37, %v933_v36  ;;  %v932_v42 = vld [vmem:[%s2461_s19 + $0x30] sm:$0xff]  ;;  %v935_v43 = vld [vmem:[%s2461_s19 + $0x48] sm:$0xff]  ;;  %1537 = vmatprep.mubr.msk.f32.mxu1 %vm2129_vm2, %v2128_v39  ;;  %v942_v45 = vld [vmem:[%s2461_s19 + $0x80] sm:$0xff]  ;;  %s1163_s24 = sshll.u32 %s2130_s20, 4  ;;  %s2619_s14 = scalar_lea.hbm %s2704_s8, %s1380_s26  ;;  %s1164_s24 = int_to_ptr.vmem [resolvable:$true] %s1163_s24 }
 0x2a3   : > { %v939_v44 = vld [vmem:[%s2461_s19 + $0x68] sm:$0xff]  ;;  %1653 = vmatprep.subr.bf16.mxu0 %v1652_v34  ;;  %v1658_v46 = vpack.c.bf16 %v935_v43, %v932_v42  ;;  %v938_v48 = vld [vmem:[%s2461_s19 + $0x60] sm:$0xff]  ;;  %v941_v49 = vld [vmem:[%s2461_s19 + $0x78] sm:$0xff]  ;;  %v908_v43 = vlaneseq  ;;  %s1968_s18 = scalar_lea.vmem %s1164_s24, 128  ;;  %p2758_p8 = scmp.eq.s32.totalorder %s2218_s13, 1 }
 0x2a4   : > { %1655 = vmatpush1.bf16.msra.mxu0 %v1654_v40  ;;  %v1660_v47 = vpack.c.bf16 %v942_v45, %v939_v44  ;;  %v945_v50 = vld [vmem:[%s2461_s19 + $0x98] sm:$0xff]  ;;  %v948_v51 = vld [vmem:[%s2461_s19 + $0xb0] sm:$0xff]  ;;  %v1662_v52 = vpack.c.bf16 %v941_v49, %v938_v48  ;;  %v947_v55 = vld [vmem:[%s2461_s19 + $0xa8] sm:$0xff]  ;;  %p1969_p9 = scmp.ne.s32.totalorder %s1164_s24, %s1968_s18  ;;  %p1975_p3 = scmp.lt.s32.totalorder %s1164_s24, %s1164_s24 }
 0x2a5   : > { %1657 = vmatprep.subr.bf16.mxu0 %v1656_v41  ;;  %v944_v53 = vld [vmem:[%s2461_s19 + $0x90] sm:$0xff]  ;;  %v1664_v54 = vpack.c.bf16 %v948_v51, %v945_v50  ;;  %v931_v57 = vld [vmem:[%s2461_s19 + $0x28] sm:$0xff]  ;;  %v954_v59 = vld [vmem:[%s2461_s19 + $0xe0] sm:$0xff]  ;;  %v909_v44 = vshrl.u32 %v908_v43, 7  ;;  %p1976_p6 = scmp.lt.s32.totalorder %s1968_s18, %s1968_s18 }
 0x2a6   : > { %v928_v56 = vld [vmem:[%s2461_s19 + $0x10] sm:$0xff]  ;;  %v951_v58 = vld [vmem:[%s2461_s19 + $0xc8] sm:$0xff]  ;;  %v934_v61 = vld [vmem:[%s2461_s19 + $0x40] sm:$0xff]  ;;  %v1666_v63 = vpack.c.bf16 %v947_v55, %v944_v53  ;;  %p1970_p10 = pnand %p1969_p9, %p2758_p8 }
 0x2a7   : > { %v1685_v60 = vpack.c.bf16 %v931_v57, %v928_v56  ;;  %v937_v62 = vld [vmem:[%s2461_s19 + $0x58] sm:$0xff]  ;;  %v950_v0 = vld [vmem:[%s2461_s19 + $0xc0] sm:$0xff]  ;;  %v1668_v2 = vpack.c.bf16 %v954_v59, %v951_v58  ;;  %v940_v4 = vld [vmem:[%s2461_s19 + $0x70] sm:$0xff]  ;;  %v910_v45 = vsub.s32 0, %v909_v44  ;;  %v914_v50 = vsub.s32 1, %v909_v44  ;;  %p1977_p0 = por %p1976_p6, %p1975_p3 }
 0x2a8   : > { %1659 = vmatpush1.bf16.msra.mxu0 %v1658_v46  ;;  %v1688_v1 = vpack.c.bf16 %v937_v62, %v934_v61  ;;  %v953_v3 = vld [vmem:[%s2461_s19 + $0xd8] sm:$0xff]  ;;  %v943_v6 = vld [vmem:[%s2461_s19 + $0x88] sm:$0xff]  ;;  %v960_v8 = vld [vmem:[%s2461_s19 + $0x110] sm:$0xff]  ;;  %p1971_p4 = pneg %p1970_p10 }
 0x2a9   : > { %1661 = vmatprep.subr.bf16.mxu0 %v1660_v47  ;;  %1686 = vmatpush3.bf16.msra.mxu1 %v1685_v60  ;;  %v957_v7 = vld [vmem:[%s2461_s19 + $0xf8] sm:$0xff]  ;;  %v1670_v9 = vpack.c.bf16 %v953_v3, %v950_v0  ;;  %v956_v10 = vld [vmem:[%s2461_s19 + $0xf0] sm:$0xff]  ;;  %v1691_v11 = vpack.c.bf16 %v943_v6, %v940_v4  ;;  %v959_v13 = vld [vmem:[%s2461_s19 + $0x108] sm:$0xff] }
 0x2aa   : > { %1687 = vmatprep.subr.bf16.mxu1 %v2127_v38  ;;  %v1672_v12 = vpack.c.bf16 %v960_v8, %v957_v7  ;;  %v946_v14 = vld [vmem:[%s2461_s19 + $0xa0] sm:$0xff]  ;;  %v949_v15 = vld [vmem:[%s2461_s19 + $0xb8] sm:$0xff]  ;;  %v963_v16 = vld [vmem:[%s2461_s19 + $0x128] sm:$0xff]  ;;  %v1674_v17 = vpack.c.bf16 %v959_v13, %v956_v10  ;;  %p1978_p11 = pnand %p1977_p0, %p1971_p4 }
 0x2ab   : > { %v966_v5 = vld [vmem:[%s2461_s19 + $0x140] sm:$0xff]  ;;  %v1694_v19 = vpack.c.bf16 %v949_v15, %v946_v14  ;;  %v965_v22 = vld [vmem:[%s2461_s19 + $0x138] sm:$0xff]  ;;  %v952_v23 = vld [vmem:[%s2461_s19 + $0xd0] sm:$0xff] }
 0x2ac   : > { %1663 = vmatpush1.bf16.msra.mxu0 %v1662_v52  ;;  %v962_v18 = vld [vmem:[%s2461_s19 + $0x120] sm:$0xff]  ;;  %v1676_v21 = vpack.c.bf16 %v966_v5, %v963_v16  ;;  %v955_v24 = vld [vmem:[%s2461_s19 + $0xe8] sm:$0xff]  ;;  %v969_v25 = vld [vmem:[%s2461_s19 + $0x158] sm:$0xff] }
 0x2ad   : > { %1665 = vmatprep.subr.bf16.mxu0 %v1664_v54  ;;  %1689 = vmatpush3.bf16.msra.mxu1 %v1688_v1  ;;  %v972_v26 = vld [vmem:[%s2461_s19 + $0x170] sm:$0xff]  ;;  %v1678_v27 = vpack.c.bf16 %v965_v22, %v962_v18  ;;  %v1697_v29 = vpack.c.bf16 %v955_v24, %v952_v23  ;;  %v971_v31 = vld [vmem:[%s2461_s19 + $0x168] sm:$0xff]  ;;  %v958_v20 = vld [vmem:[%s2461_s19 + $0x100] sm:$0xff] }
 0x2ae   : > { %1690 = vmatprep.subr.bf16.mxu1 %v2127_v38  ;;  %v968_v28 = vld [vmem:[%s2461_s19 + $0x150] sm:$0xff]  ;;  %v1680_v30 = vpack.c.bf16 %v972_v26, %v969_v25  ;;  %v961_v32 = vld [vmem:[%s2461_s19 + $0x118] sm:$0xff]  ;;  %v967_v36 = vld [vmem:[%s2461_s19 + $0x148] sm:$0xff] }
 0x2af   : > { %v1682_v33 = vpack.c.bf16 %v971_v31, %v968_v28  ;;  %v1700_v34 = vpack.c.bf16 %v961_v32, %v958_v20  ;;  %v964_v35 = vld [vmem:[%s2461_s19 + $0x130] sm:$0xff]  ;;  %v970_v40 = vld [vmem:[%s2461_s19 + $0x160] sm:$0xff]  ;;  %v973_v41 = vld [vmem:[%s2461_s19 + $0x178] sm:$0xff]  ;;  %s1176_s19 = sshll.u32 %s2481_s15, 4  ;;  %s2621_s19 = int_to_ptr.vmem [resolvable:$true] %s1176_s19 }
 0x2b0   : > { %1667 = vmatpush1.bf16.msra.mxu0 %v1666_v63  ;;  %v902_v37 = vld [vmem:[#allocation3] sm:$0xff]  ;;  %v1703_v39 = vpack.c.bf16 %v967_v36, %v964_v35  ;;  %v1706_v42 = vpack.c.bf16 %v973_v41, %v970_v40  ;;  %v906_v46 = vld [vmem:[%s2479_s25] sm:$0x7]  ;;  %v903_v48 = vld [vmem:[#allocation4] sm:$0xff]  ;;  %v918_v63 = vsub.s32 2, %v909_v44 }
 0x2b1   : > { %1669 = vmatprep.subr.bf16.mxu0 %v1668_v2  ;;  %1692 = vmatpush3.bf16.msra.mxu1 %v1691_v11  ;;  %v911_v47 = vrot.slane %v906_v46, %v910_v45  ;;  %v915_v53 = vrot.slane %v906_v46, %v914_v50  ;;  %v904_v55 = vld [vmem:[#allocation4 + $0x8] sm:$0xff]  ;;  %v1377_v0 = vld [vmem:[%s499_s16] ss:$0 sm:$0xff] }
 0x2b2   : > { %1693 = vmatprep.subr.bf16.mxu1 %v2127_v38  ;;  %v919_v1 = vrot.slane %v906_v46, %v918_v63  ;;  %v905_v2 = vld [vmem:[#allocation4 + $0x10] sm:$0xff] }
 0x2b3   : > { %v923_v49 = vadd.f32 %v911_v47, %v903_v48  ;;  %v924_v57 = vadd.f32 %v915_v53, %v904_v55 }
 0x2b4   : > { %1671 = vmatpush1.bf16.msra.mxu0 %v1670_v9  ;;  %v925_v6 = vadd.f32 %v919_v1, %v905_v2 }
 0x2b5   : > { %1673 = vmatprep.subr.bf16.mxu0 %v1672_v12  ;;  %1695 = vmatpush3.bf16.msra.mxu1 %v1694_v19 }
 0x2b6   : > { %1696 = vmatprep.subr.bf16.mxu1 %v2127_v38 }
 0x2b8   : > { %1675 = vmatpush1.bf16.msra.mxu0 %v1674_v17 }
 0x2b9   : > { %1677 = vmatprep.subr.bf16.mxu0 %v1676_v21  ;;  %1698 = vmatpush3.bf16.msra.mxu1 %v1697_v29 }
 0x2ba   : > { %1699 = vmatprep.subr.bf16.mxu1 %v2127_v38 }
 0x2bc   : > { %1679 = vmatpush1.bf16.msra.mxu0 %v1678_v27 }
 0x2bd   : > { %1681 = vmatprep.subr.bf16.mxu0 %v1680_v30  ;;  %1701 = vmatpush3.bf16.msra.mxu1 %v1700_v34 }
 0x2be   : > { %1702 = vmatprep.subr.bf16.mxu1 %v2127_v38 }
 0x2c0   : > { %1683 = vmatpush1.bf16.msra.mxu0 %v1682_v33 }
 0x2c1   : > { %1704 = vmatpush3.bf16.msra.mxu1 %v1703_v39 }
 0x2c2   : > { %1705 = vmatprep.subr.bf16.mxu1 %v2127_v38 }
 0x2c3   : > { %1039 = vmatmul.mubr.f32.vlgmr.msra.gmra.mrb[0].mxu0 %v902_v37 }
 0x2c5   : > { %1707 = vmatpush3.bf16.msra.mxu1 %v1706_v42 }
 0x2c8   : > { %1538 = vmatmul.mubr.f32.vlgmr.msra.gmra.mrb[0].mxu1 %v902_v37 }
 0x396   : > { %v1040_v51 = vpop.f32.mrb[0].mxu0 }
 0x397   : > { %v1115_v52 = vadd.f32 %v1040_v51, %v923_v49  ;;  %v1042_v54 = vpop.f32.mrb[1].mxu0 }
 0x398   : > { %v1122_v58 = vadd.f32 %v1042_v54, %v924_v57 }
 0x399   : > { %v1375_v56 = vmul.f32 -1.442695, %v1115_v52 }
 0x39a   : > { %v1376_v60 = vmul.f32 -1.442695, %v1122_v58 }
 0x39b   : > { %1840 = vpow2.f32 %v1375_v56  ;;  %v1111_v38 = vpop.f32.mrb[0].mxu1 }
 0x39c   : > { %v1539_v59 = vpop.f32.mrb[1].mxu1  ;;  %1842 = vpow2.f32 %v1376_v60  ;;  %v1136_v3 = vadd.f32 %v1377_v0, %v1111_v38 }
 0x3a5   : > { %v1841_v61 = vpop.eup %1840 }
 0x3a6   : > { %v1119_v62 = vadd.f32 1.0, %v1841_v61  ;;  %v1843_v4 = vpop.eup %1842 }
 0x3a7   : > { %v1126_v9 = vadd.f32 1.0, %v1843_v4 }
 0x3a8   : > { %1844 = vrcp.f32 %v1119_v62 }
 0x3b2   : > { %v1845_v7 = vpop.eup %1844 }
 0x3b3   : > { %v1137_v8 = vmul.f32 %v1845_v7, %v1136_v3 }
 0x3b5   : > { %v1138_v10 = vadd.f32 %v1137_v8, %v925_v6 }
 0x3b7   : > { %1846 = vtanh.f32 %v1138_v10 }
 0x3b8   : > { %1848 = vrcp.f32 %v1126_v9 }
 0x3c1   : > { %v1847_v11 = vpop.eup %1846 }
 0x3c2   : > { %v1140_v12 = vsub.f32 %v902_v37, %v1847_v11  ;;  %v1849_v13 = vpop.eup %1848 }
 0x3c4   : > { %v1141_v14 = vmul.f32 %v1849_v13, %v1140_v12 }
 0x3c6   : > { %v1142_v15 = vadd.f32 %v1847_v11, %v1141_v14 }
 0x3c8   : > { %1143 = vst [vmem:[#allocation3] sm:$0xff] %v1142_v15  ;;  %1146 = vst [vmem:[#allocation2] sm:$0xff] %v1142_v15 }
 0x3c9   : > { %1147 = vst [vmem:[#allocation12] sm:$0xff] %v1142_v15  ;;  %1148 = vst [vmem:[%s2481_s15] sm:$0xff] %v1142_v15 }
 0x3ca   : > { %1981 = shalt.err (!%p1978_p11)
}
 0x3cb   : > { %s1982_s3 = scalar_lea.hbm %s2703_s7, 128  ;;  %p2759_p13 = pmov %p2758_p8 }
 0x3cc   : > { %p1983_p7 = scmp.ne.s32.totalorder %s2703_s7, %s1982_s3  ;;  %p1988_p5 = scmp.lt.u32.totalorder %s1982_s3, %s2703_s7 }
 0x3ce   : > { %p1984_p2 = pnand %p1983_p7, %p2759_p13 }
 0x3d0   : > { %p1985_p1 = pneg %p1984_p2 }
 0x3d2   : > { %p1990_p12 = pnand %p1988_p5, %p1985_p1 }
 0x3d4   : > { %1993 = shalt.err (!%p1990_p12)
}
 0x3d5   : > { %p2760_p9 = pmov %p2758_p8  ;;  %s2761_s9 = sld [smem:[#allocation24_spill]] }
 0x3d6   : > { %s1150_s20 = scalar_lea.sflag [#allocation14], %s2442_s27  ;;  %s1994_s26 = scalar_lea.vmem %s2621_s19, 128 }
 0x3d7   : > { %1726 = dma.vmem_to_hbm [thread:$0]  (%p2760_p9), %s1164_s24, 128, %s2703_s7, [#allocation7]  }
 0x3d8   : > { %p1995_p8 = scmp.ne.s32.totalorder %s2621_s19, %s1994_s26  ;;  %s2131_s17 = smov [#allocation13]  }
 0x3d9   : > { %s1998_s22 = sshll.u32 %s2131_s17, 4  ;;  %s1999_s22 = int_to_ptr.vmem [resolvable:$false] %s1998_s22 }
 0x3da   : > { %s2000_s18 = scalar_lea.vmem %s1999_s22, 256  ;;  %p2001_p6 = scmp.lt.s32.totalorder %s2621_s19, %s1999_s22 }
 0x3db   : > { %p2762_p10 = scmp.ne.s32.totalorder %s2761_s9, 0  ;;  %p2002_p0 = scmp.lt.s32.totalorder %s2000_s18, %s1994_s26 }
 0x3dd   : > { %p1996_p4 = pnand %p1995_p8, %p2762_p10  ;;  %p2003_p11 = por %p2002_p0, %p2001_p6 }
 0x3df   : > { %p1997_p3 = pneg %p1996_p4 }
 0x3e1   : > { %p2004_p7 = pnand %p2003_p11, %p1997_p3 }
 0x3e3   : > { %2007 = shalt.err (!%p2004_p7)
}
 0x3e4   : > { %s2008_s27 = scalar_lea.hbm %s2619_s14, 128  ;;  %s2012_s16 = scalar_lea.hbm %s2704_s8, 256 }
 0x3e5   : > { %p2009_p13 = scmp.ne.s32.totalorder %s2619_s14, %s2008_s27  ;;  %p2013_p5 = scmp.lt.u32.totalorder %s2619_s14, %s2704_s8 }
 0x3e6   : > { %p2014_p12 = scmp.lt.u32.totalorder %s2012_s16, %s2008_s27  ;;  %p2016_p8 = scmp.lt.u32.totalorder %s2008_s27, %s2619_s14 }
 0x3e7   : > { %p2010_p2 = pnand %p2009_p13, %p2762_p10 }
 0x3e8   : > { %p2015_p9 = por %p2014_p12, %p2013_p5 }
 0x3e9   : > { %p2011_p1 = pneg %p2010_p2 }
 0x3ea   : > { %p2017_p4 = por %p2016_p8, %p2015_p9 }
 0x3ec   : > { %p2018_p3 = pnand %p2017_p4, %p2011_p1 }
 0x3ee   : > { %2021 = shalt.err (!%p2018_p3)
}
 0x3ef   : > { %1727 = dma.vmem_to_hbm [thread:$0]  (%p2762_p10), %s2621_s19, 128, %s2619_s14, %s1150_s20  }
 0x3f0   : > { %p2763_p6 = scmp.eq.s32.totalorder %s2218_s13, 1 }
 0x3f2   : > { %2075 = dma.done.wait (%p2763_p6), [#allocation7], 128   ;;  %p2764_p0 = pmov %p2763_p6 }
 0x3f4   : > { %2077 = vsyncadd (%p2764_p0), [#allocation7], 4294967168 }
 0x3f5 PF: > { %s2765_s25 = sld [smem:[#allocation25_spill]]  ;;  %s1192_s15 = sand.u32 1, %s2093_s29  }
 0x3f6   : > { %p2767_p7 = scmp.ge.s32.totalorder %s2113_s12, 2  ;;  %s1193_s1 = scalar_lea.sflag [#allocation14], %s1192_s15 }
 0x3fb   : > { %p2766_p11 = scmp.ne.s32.totalorder %s2765_s25, 0 }
 0x3fd   : > { %p1746_p13 = pnand %p2767_p7, %p2766_p11 }
 0x3ff   : > { %2079 = dma.done.wait (!%p1746_p13), %s1193_s1, 128  }
 0x400   : > { %2081 = vsyncadd (!%p1746_p13), %s1193_s1, 4294967168  ;;  %s27_s12 = sadd.s32 1, %s2113_s12   ;;  %s2768_s19 = sld [smem:[#allocation21_spill]] }
 0x401   : > { %p24_p2 = scmp.ge.s32.totalorder %s27_s12, 4   ;;  %s2769_s9 = sld [smem:[#allocation23_spill]] }
 0x402   : > { %s2770_s13 = sld [smem:[#allocation22_spill]]  ;;  %s2771_s27 = smov %s2089_s28 }
 0x403   : > { %s2677_s28 = smov 0   ;;  %s2772_s29 = smov %s2097_s30 }
 0x404   : > { %s2774_s10 = smov %s2109_s11  ;;  %26 = sbr.rel (!%p24_p2) target bundleno = 13 (0xd), region = 152 }
 0x406   : > { %s2773_s30 = smov %s2768_s19 }
 0x408   : > { %s2775_s11 = smov %s2770_s13 }
 0x40b   :  { %1198 = vsyncpa [#allocation6], 1 }
 0x40c   :  { %1200 = vsyncpa [#allocation6 + $0x1], 1 }
 0x40d   :  { %1201 = vsyncpa [#allocation9], 1 }
 0x40e   :  { %1202 = vsyncpa [#allocation7], 1 }
 0x40f   :  { %1204 = vsyncpa [#allocation7 + $0x1], 1 }
 0x410   :  { %1205 = vsyncpa [#allocation14], 1 }
 0x411   :  { %1207 = vsyncpa [#allocation14 + $0x1], 1 }

</bundles_post_ra>
